<compile_context>
chip_gen: v7x
topology: tpu7x:2x2x1
jax: 0.10.0
libtpu: 0.0.40
codegen_flags: <defaults>
</compile_context>

<pallas_src>
import math
from functools import partial

import jax
import jax.numpy as jnp
from jax.experimental import pallas as pl
from jax.experimental.pallas import tpu as pltpu


# ---------------------------------------------------------------------------
# Per-chip knobs (decided once at import time from the local device kind).
# ---------------------------------------------------------------------------

def _chip_kind():
    try:
        return jax.devices()[0].device_kind.lower()
    except Exception:  # pragma: no cover - defensive
        return ""


_KIND = _chip_kind()
# v5e / v6e: 128 MiB physical VMEM -> big tiles + VMEM-resident FFN weights.
# v7x / unknown: 64 MiB physical -> stay conservative, F-tile the FFN.
_VMEM_BUDGET = (96 * 1024 * 1024 if ("v5" in _KIND or "v6" in _KIND)
                else 48 * 1024 * 1024)
# v6e/v7x EUP runs bf16 transcendentals ~2x fp32; v5e has no bf16 EUP/VPU.
_EUP_DTYPE = jnp.float32 if "v5" in _KIND else jnp.bfloat16


def _pick_tile(dim, pref):
    """Largest power-of-two-ish tile <= pref that divides dim (>=128), else dim."""
    t = pref
    while t >= 128 and dim % t:
        t //= 2
    return t if dim % t == 0 else dim


# ---------------------------------------------------------------------------
# Linear: y = x @ w + b.  Full-K / full-N weight block (constant index map ->
# streamed from HBM exactly once), grid only over M, no accumulator scratch.
# Used for the fused QKV projection.
# ---------------------------------------------------------------------------

def _linear_kernel(x_ref, w_ref, b_ref, o_ref):
    y = jnp.dot(x_ref[...], w_ref[...], preferred_element_type=jnp.float32)
    o_ref[...] = (y + b_ref[...]).astype(o_ref.dtype)


def linear(x, w, b, tm=512):
    M, K = x.shape
    N = w.shape[1]
    tm = _pick_tile(M, tm)
    return pl.pallas_call(
        _linear_kernel,
        out_shape=jax.ShapeDtypeStruct((M, N), jnp.bfloat16),
        grid=(M // tm,),
        in_specs=[
            pl.BlockSpec((tm, K), lambda i: (i, 0)),
            pl.BlockSpec((K, N), lambda i: (0, 0)),   # constant -> fetched once
            pl.BlockSpec((1, N), lambda i: (0, 0)),
        ],
        out_specs=pl.BlockSpec((tm, N), lambda i: (i, 0)),
        compiler_params=pltpu.CompilerParams(
            dimension_semantics=("parallel",),
            vmem_limit_bytes=_VMEM_BUDGET),
    )(x, w, b.reshape(1, N).astype(jnp.float32))


# ---------------------------------------------------------------------------
# Fused matmul + bias + residual + LayerNorm (attention out-projection + LN1).
# K = N = hidden fits in a single block, so no K grid and no fp32 scratch.
# ---------------------------------------------------------------------------

def _ln_epilogue(h, g, bt, o_ref, eps):
    mu = jnp.mean(h, axis=-1, keepdims=True)
    d = h - mu
    var = jnp.mean(d * d, axis=-1, keepdims=True)
    o_ref[...] = (d * jax.lax.rsqrt(var + eps) * g + bt).astype(o_ref.dtype)


def _matmul_res_ln_kernel(x_ref, w_ref, b_ref, r_ref, g_ref, bt_ref, o_ref,
                          *, eps):
    y = jnp.dot(x_ref[...], w_ref[...], preferred_element_type=jnp.float32)
    h = y + b_ref[...] + r_ref[...].astype(jnp.float32)
    _ln_epilogue(h, g_ref[...], bt_ref[...], o_ref, eps)


def matmul_residual_ln(x, w, b, res, gamma, beta, eps=1e-5, tm=512):
    M, K = x.shape
    N = w.shape[1]
    tm = _pick_tile(M, tm)
    return pl.pallas_call(
        partial(_matmul_res_ln_kernel, eps=eps),
        out_shape=jax.ShapeDtypeStruct((M, N), jnp.bfloat16),
        grid=(M // tm,),
        in_specs=[
            pl.BlockSpec((tm, K), lambda i: (i, 0)),
            pl.BlockSpec((K, N), lambda i: (0, 0)),   # constant -> fetched once
            pl.BlockSpec((1, N), lambda i: (0, 0)),
            pl.BlockSpec((tm, N), lambda i: (i, 0)),
            pl.BlockSpec((1, N), lambda i: (0, 0)),
            pl.BlockSpec((1, N), lambda i: (0, 0)),
        ],
        out_specs=pl.BlockSpec((tm, N), lambda i: (i, 0)),
        compiler_params=pltpu.CompilerParams(
            dimension_semantics=("parallel",),
            vmem_limit_bytes=_VMEM_BUDGET),
    )(x, w, b.reshape(1, N).astype(jnp.float32), res,
      gamma.reshape(1, N).astype(jnp.float32),
      beta.reshape(1, N).astype(jnp.float32))


# ---------------------------------------------------------------------------
# Fused FFN: LN( gelu(x @ w1 + b1) @ w2 + b2 + residual )
# Weights VMEM-resident (tf == F, constant index maps, no scratch) when the
# VMEM budget allows; otherwise F-tiled with a (tm, H) fp32 accumulator.
# The GELU intermediate is bf16 and never leaves VMEM in either path.
# ---------------------------------------------------------------------------

def _ffn_ln_kernel(x_ref, w1_ref, b1_ref, w2_ref, b2_ref, r_ref, g_ref, bt_ref,
                   o_ref, *scratch, eps):
    t = jnp.dot(x_ref[...], w1_ref[...], preferred_element_type=jnp.float32)
    t = jax.nn.gelu((t + b1_ref[...]).astype(_EUP_DTYPE)).astype(jnp.bfloat16)
    y = jnp.dot(t, w2_ref[...], preferred_element_type=jnp.float32)

    if scratch:                               # F-tiled: accumulate over f axis
        acc_ref = scratch[0]

        @pl.when(pl.program_id(1) == 0)
        def _():
            acc_ref[...] = jnp.zeros_like(acc_ref)

        acc_ref[...] += y

        @pl.when(pl.program_id(1) == pl.num_programs(1) - 1)
        def _():
            h = acc_ref[...] + b2_ref[...] + r_ref[...].astype(jnp.float32)
            _ln_epilogue(h, g_ref[...], bt_ref[...], o_ref, eps)
    else:                                     # weights-resident: single F step
        h = y + b2_ref[...] + r_ref[...].astype(jnp.float32)
        _ln_epilogue(h, g_ref[...], bt_ref[...], o_ref, eps)


def ffn_ln(x, w1, b1, w2, b2, res, gamma, beta, eps=1e-5, tm=512, tf=None):
    M, H = x.shape
    F = w1.shape[1]
    tm = _pick_tile(M, tm)
    if tf is None:
        # Big VMEM (v5e/v6e): keep both weights resident -> streamed once per
        # layer.  Small VMEM (v7x): tile F to keep the working set < ~16 MiB.
        tf = F if _VMEM_BUDGET >= 64 * 1024 * 1024 else _pick_tile(F, 1024)
    nf = F // tf

    b1r = b1.reshape(1, F).astype(jnp.float32)
    b2r = b2.reshape(1, H).astype(jnp.float32)
    g = gamma.reshape(1, H).astype(jnp.float32)
    bt = beta.reshape(1, H).astype(jnp.float32)

    if nf == 1:
        grid = (M // tm,)
        in_specs = [
            pl.BlockSpec((tm, H), lambda i: (i, 0)),
            pl.BlockSpec((H, F), lambda i: (0, 0)),    # constant -> fetched once
            pl.BlockSpec((1, F), lambda i: (0, 0)),
            pl.BlockSpec((F, H), lambda i: (0, 0)),    # constant -> fetched once
            pl.BlockSpec((1, H), lambda i: (0, 0)),
            pl.BlockSpec((tm, H), lambda i: (i, 0)),
            pl.BlockSpec((1, H), lambda i: (0, 0)),
            pl.BlockSpec((1, H), lambda i: (0, 0)),
        ]
        out_specs = pl.BlockSpec((tm, H), lambda i: (i, 0))
        scratch = []
        sem = ("parallel",)
    else:
        grid = (M // tm, nf)
        in_specs = [
            pl.BlockSpec((tm, H), lambda i, f: (i, 0)),
            pl.BlockSpec((H, tf), lambda i, f: (0, f)),
            pl.BlockSpec((1, tf), lambda i, f: (0, f)),
            pl.BlockSpec((tf, H), lambda i, f: (f, 0)),
            pl.BlockSpec((1, H), lambda i, f: (0, 0)),
            pl.BlockSpec((tm, H), lambda i, f: (i, 0)),
            pl.BlockSpec((1, H), lambda i, f: (0, 0)),
            pl.BlockSpec((1, H), lambda i, f: (0, 0)),
        ]
        out_specs = pl.BlockSpec((tm, H), lambda i, f: (i, 0))
        scratch = [pltpu.VMEM((tm, H), jnp.float32)]
        sem = ("parallel", "arbitrary")

    return pl.pallas_call(
        partial(_ffn_ln_kernel, eps=eps),
        out_shape=jax.ShapeDtypeStruct((M, H), jnp.bfloat16),
        grid=grid,
        in_specs=in_specs,
        out_specs=out_specs,
        scratch_shapes=scratch,
        compiler_params=pltpu.CompilerParams(
            dimension_semantics=sem, vmem_limit_bytes=_VMEM_BUDGET),
    )(x, w1, b1r, w2, b2r, res, g, bt)


# ---------------------------------------------------------------------------
# Embedding add + LayerNorm: word (B,S,H) + pos (S,H) (pos never broadcast /
# materialized to (B,S,H); the kernel's index_map reuses the (S,H) table).
# ---------------------------------------------------------------------------

def _emb_ln_kernel(w_ref, p_ref, g_ref, b_ref, o_ref, *, eps):
    h = w_ref[0].astype(jnp.float32) + p_ref[...].astype(jnp.float32)
    mu = jnp.mean(h, axis=-1, keepdims=True)
    d = h - mu
    var = jnp.mean(d * d, axis=-1, keepdims=True)
    o_ref[0] = (d * jax.lax.rsqrt(var + eps) * g_ref[...]
                + b_ref[...]).astype(o_ref.dtype)


def embed_add_ln(word, pos, gamma, beta, eps=1e-5, ts=256):
    B, S, H = word.shape
    ts = _pick_tile(S, ts)
    return pl.pallas_call(
        partial(_emb_ln_kernel, eps=eps),
        out_shape=jax.ShapeDtypeStruct((B, S, H), jnp.bfloat16),
        grid=(B, S // ts),
        in_specs=[
            pl.BlockSpec((1, ts, H), lambda b, j: (b, j, 0)),
            pl.BlockSpec((ts, H), lambda b, j: (j, 0)),
            pl.BlockSpec((1, H), lambda b, j: (0, 0)),
            pl.BlockSpec((1, H), lambda b, j: (0, 0)),
        ],
        out_specs=pl.BlockSpec((1, ts, H), lambda b, j: (b, j, 0)),
        compiler_params=pltpu.CompilerParams(
            dimension_semantics=("parallel", "parallel"),
            vmem_limit_bytes=_VMEM_BUDGET),
    )(word, pos, gamma.reshape(1, H).astype(jnp.float32),
      beta.reshape(1, H).astype(jnp.float32))


# ---------------------------------------------------------------------------
# Multi-head attention on the fused-QKV tensor.
#
# Fast path (real model: head_dim=64, H%128==0): grid=(B, num_head_pairs);
# each grid point reads three 128-lane slabs (two heads of Q, K, V) directly
# out of the fused (B,S,3H) tensor via index_map lane slicing and writes one
# lane-dense (1,S,128) output block.  Both axes "parallel" (v7x 2-TC sharding).
#
# Fallback (odd head dims / tiny hidden): whole (1,S,3H) block per batch,
# head loop inside the kernel (same as the previously verified version).
# ---------------------------------------------------------------------------

def _softmax_pv(s, v, out_dtype):
    """Row softmax of fp32 scores s, then p @ v.  exp in _EUP_DTYPE, stats fp32."""
    s = s - jnp.max(s, axis=-1, keepdims=True)
    p = jnp.exp(s.astype(_EUP_DTYPE))
    denom = jnp.sum(p.astype(jnp.float32), axis=-1, keepdims=True)
    p = (p * pl.reciprocal(denom, approx=True).astype(p.dtype)).astype(jnp.bfloat16)
    return jnp.dot(p, v, preferred_element_type=jnp.float32).astype(out_dtype)


def _attn_slab_kernel(q_ref, k_ref, v_ref, bias_ref, o_ref,
                      *, heads, head_dim, scale):
    bias = bias_ref[0]                                  # (1, S) additive key mask
    outs = []
    for h in range(heads):
        lo = h * head_dim
        q = q_ref[0, :, lo:lo + head_dim]               # (S, Dh) bf16
        k = k_ref[0, :, lo:lo + head_dim]
        v = v_ref[0, :, lo:lo + head_dim]
        qs = (q.astype(jnp.float32) * scale).astype(jnp.bfloat16)
        s = jax.lax.dot_general(qs, k, (((1,), (1,)), ((), ())),
                                preferred_element_type=jnp.float32)   # (S, S)
        outs.append(_softmax_pv(s + bias, v, o_ref.dtype))
    o_ref[0] = jnp.concatenate(outs, axis=-1)           # lane-dense 128-wide store


def _attn_full_kernel(qkv_ref, bias_ref, o_ref, *, num_heads, head_dim, scale):
    H = num_heads * head_dim
    bias = bias_ref[0]
    for h in range(num_heads):
        lo = h * head_dim
        q = qkv_ref[0, :, lo:lo + head_dim]
        k = qkv_ref[0, :, H + lo:H + lo + head_dim]
        v = qkv_ref[0, :, 2 * H + lo:2 * H + lo + head_dim]
        qs = (q.astype(jnp.float32) * scale).astype(jnp.bfloat16)
        s = jax.lax.dot_general(qs, k, (((1,), (1,)), ((), ())),
                                preferred_element_type=jnp.float32)
        o_ref[0, :, lo:lo + head_dim] = _softmax_pv(s + bias, v, o_ref.dtype)


def mha_attention(qkv, bias, *, num_heads):
    """qkv: (B, S, 3H) bf16 (fused QKV proj); bias: (B, 1, S) additive fp32."""
    B, S, threeH = qkv.shape
    H = threeH // 3
    head_dim = H // num_heads
    scale = 1.0 / math.sqrt(head_dim)

    if H % 128 == 0 and 128 % head_dim == 0:
        heads_per_blk = 128 // head_dim
        n_slabs = num_heads // heads_per_blk
        koff = H // 128
        voff = 2 * H // 128
        return pl.pallas_call(
            partial(_attn_slab_kernel, heads=heads_per_blk,
                    head_dim=head_dim, scale=scale),
            out_shape=jax.ShapeDtypeStruct((B, S, H), jnp.bfloat16),
            grid=(B, n_slabs),
            in_specs=[
                pl.BlockSpec((1, S, 128), lambda b, j: (b, 0, j)),
                pl.BlockSpec((1, S, 128), lambda b, j: (b, 0, koff + j)),
                pl.BlockSpec((1, S, 128), lambda b, j: (b, 0, voff + j)),
                pl.BlockSpec((1, 1, S), lambda b, j: (b, 0, 0)),
            ],
            out_specs=pl.BlockSpec((1, S, 128), lambda b, j: (b, 0, j)),
            compiler_params=pltpu.CompilerParams(
                dimension_semantics=("parallel", "parallel"),
                vmem_limit_bytes=_VMEM_BUDGET),
        )(qkv, qkv, qkv, bias)

    # Fallback for lane-unfriendly head sizes.
    return pl.pallas_call(
        partial(_attn_full_kernel, num_heads=num_heads, head_dim=head_dim,
                scale=scale),
        out_shape=jax.ShapeDtypeStruct((B, S, H), jnp.bfloat16),
        grid=(B,),
        in_specs=[
            pl.BlockSpec((1, S, threeH), lambda b: (b, 0, 0)),
            pl.BlockSpec((1, 1, S), lambda b: (b, 0, 0)),
        ],
        out_specs=pl.BlockSpec((1, S, H), lambda b: (b, 0, 0)),
        compiler_params=pltpu.CompilerParams(
            dimension_semantics=("parallel",),
            vmem_limit_bytes=_VMEM_BUDGET),
    )(qkv, bias)


# ---------------------------------------------------------------------------
# Parameters (deterministic synthetic init, bf16 weights) and forward pass
# ---------------------------------------------------------------------------

def init_params(key, *, vocab, max_pos, H, F, L):
    def dense(k, shape):
        return (0.02 * jax.random.normal(k, shape)).astype(jnp.bfloat16)

    k = jax.random.split(key, 6)
    return {
        "word_emb": dense(k[0], (vocab, H)),
        "pos_emb": dense(k[1], (max_pos, H)),
        "emb_ln_g": jnp.ones((H,), jnp.float32),
        "emb_ln_b": jnp.zeros((H,), jnp.float32),
        # Per-layer params stacked along a leading L axis for lax.scan.
        "layers": {
            "wqkv": dense(k[2], (L, H, 3 * H)),
            "bqkv": jnp.zeros((L, 3 * H), jnp.float32),
            "wo": dense(k[3], (L, H, H)),
            "bo": jnp.zeros((L, H), jnp.float32),
            "ln1_g": jnp.ones((L, H), jnp.float32),
            "ln1_b": jnp.zeros((L, H), jnp.float32),
            "w1": dense(k[4], (L, H, F)),
            "b1": jnp.zeros((L, F), jnp.float32),
            "w2": dense(k[5], (L, F, H)),
            "b2": jnp.zeros((L, H), jnp.float32),
            "ln2_g": jnp.ones((L, H), jnp.float32),
            "ln2_b": jnp.zeros((L, H), jnp.float32),
        },
    }


@partial(jax.jit, static_argnames=("num_heads",))
def _encoder_forward(params, input_ids, attention_mask, num_heads):
    B, S = input_ids.shape
    H = params["word_emb"].shape[1]

    # Embedding gather is XLA glue; everything downstream is Pallas.
    word = jnp.take(params["word_emb"], input_ids, axis=0)            # (B,S,H)
    h = embed_add_ln(word, params["pos_emb"][:S],
                     params["emb_ln_g"], params["emb_ln_b"])           # (B,S,H)
    h = h.reshape(B * S, H)

    # Additive attention bias from the 0/1 key mask.
    bias = ((1.0 - attention_mask.astype(jnp.float32)) * -1e9)[:, None, :]

    def layer(h, lp):
        qkv = linear(h, lp["wqkv"], lp["bqkv"])                        # (B*S,3H)
        attn = mha_attention(qkv.reshape(B, S, 3 * H), bias,
                             num_heads=num_heads)                      # (B,S,H)
        h = matmul_residual_ln(attn.reshape(B * S, H), lp["wo"], lp["bo"],
                               h, lp["ln1_g"], lp["ln1_b"])            # out-proj + LN1
        h = ffn_ln(h, lp["w1"], lp["b1"], lp["w2"], lp["b2"],
                   h, lp["ln2_g"], lp["ln2_b"])                        # FFN + LN2
        return h, None

    h, _ = jax.lax.scan(layer, h, params["layers"])

    # forward(): sequence_output[:, 0, :]  (self.pooler is defined but unused)
    return h.reshape(B, S, H)[:, 0, :].astype(jnp.float32)


def distilroberta_encoder_forward(params, input_ids, attention_mask=None, *,
                                  num_heads):
    if attention_mask is None:
        attention_mask = jnp.ones(input_ids.shape, dtype=jnp.int32)
    return _encoder_forward(params, input_ids, attention_mask,
                            num_heads=num_heads)


if __name__ == "__main__":
    # Small config consistent with the module (real distilroberta:
    # H=768, NH=12 (head_dim=64), F=3072, L=6, vocab=50265).  H=128/NH=2 keeps
    # head_dim=64 so the 128-lane attention slab path is exercised.
    B, S, H, NH, F, L, VOCAB, MAX_POS = 2, 8, 128, 2, 512, 2, 100, 16

    key = jax.random.PRNGKey(0)
    pkey, ikey = jax.random.split(key)
    params = init_params(pkey, vocab=VOCAB, max_pos=MAX_POS, H=H, F=F, L=L)

    input_ids = jax.random.randint(ikey, (B, S), 4, VOCAB, dtype=jnp.int32)
    attention_mask = jnp.array([[1] * S, [1] * (S - 2) + [0] * 2],
                               dtype=jnp.int32)

    feat = distilroberta_encoder_forward(params, input_ids, attention_mask,
                                         num_heads=NH)
    feat = jax.block_until_ready(feat)
    assert feat.shape == (B, H) and feat.dtype == jnp.float32
    assert bool(jnp.all(jnp.isfinite(feat)))

    # Also exercise the F-tiled FFN accumulation path (used on VMEM-constrained
    # chips such as v7x) and check it against the weights-resident path.
    kx, kr = jax.random.split(jax.random.PRNGKey(1))
    xs = (0.1 * jax.random.normal(kx, (16, H))).astype(jnp.bfloat16)
    rs = (0.1 * jax.random.normal(kr, (16, H))).astype(jnp.bfloat16)
    lp = params["layers"]
    y_full = ffn_ln(xs, lp["w1"][0], lp["b1"][0], lp["w2"][0], lp["b2"][0],
                    rs, lp["ln2_g"][0], lp["ln2_b"][0], tf=F)
    y_tile = ffn_ln(xs, lp["w1"][0], lp["b1"][0], lp["w2"][0], lp["b2"][0],
                    rs, lp["ln2_g"][0], lp["ln2_b"][0], tf=F // 4)
    y_full, y_tile = jax.block_until_ready((y_full, y_tile))
    assert jnp.allclose(y_full.astype(jnp.float32), y_tile.astype(jnp.float32),
                        atol=3e-2, rtol=3e-2)

    print("KERNEL_OK")
</pallas_src>

<mosaic_0001>
module attributes {stable_mosaic.version = 11 : i64} {
  func.func @_emb_ln_kernel(%arg0: i32, %arg1: i32, %arg2: memref<1x8x128xbf16, #tpu.memory_space<vmem>>, %arg3: memref<8x128xbf16, #tpu.memory_space<vmem>>, %arg4: memref<1x128xf32, #tpu.memory_space<vmem>>, %arg5: memref<1x128xf32, #tpu.memory_space<vmem>>, %arg6: memref<1x8x128xbf16, #tpu.memory_space<vmem>>) attributes {dimension_semantics = [#tpu.dimension_semantics<parallel>, #tpu.dimension_semantics<parallel>], iteration_bounds = array<i64: 2, 1>, scalar_prefetch = 0 : i64, scratch_operands = 0 : i64, tpu.core_type = #tpu.core_type<tc>, window_params = [{transform_indices = @transform_0, window_bounds = array<i64: 1, 8, 128>}, {transform_indices = @transform_1, window_bounds = array<i64: 8, 128>}, {pipeline_mode = #tpu.pipeline_mode<synchronous>, transform_indices = @transform_2, window_bounds = array<i64: 1, 128>}, {pipeline_mode = #tpu.pipeline_mode<synchronous>, transform_indices = @transform_3, window_bounds = array<i64: 1, 128>}, {transform_indices = @transform_4, window_bounds = array<i64: 1, 8, 128>}]} {
    %c0 = arith.constant 0 : index
    %c0_0 = arith.constant 0 : index
    %c0_1 = arith.constant 0 : index
    %0 = vector.load %arg2[%c0, %c0_0, %c0_1] : memref<1x8x128xbf16, #tpu.memory_space<vmem>>, vector<1x8x128xbf16>
    %1 = vector.shape_cast %0 : vector<1x8x128xbf16> to vector<8x128xbf16>
    %2 = arith.extf %1 : vector<8x128xbf16> to vector<8x128xf32>
    %c0_2 = arith.constant 0 : index
    %c0_3 = arith.constant 0 : index
    %3 = vector.load %arg3[%c0_2, %c0_3] : memref<8x128xbf16, #tpu.memory_space<vmem>>, vector<8x128xbf16>
    %4 = arith.extf %3 : vector<8x128xbf16> to vector<8x128xf32>
    %5 = arith.addf %2, %4 : vector<8x128xf32>
    %cst = arith.constant dense<0.000000e+00> : vector<8xf32>
    %6 = vector.multi_reduction <add>, %5, %cst [1] : vector<8x128xf32> to vector<8xf32>
    %7 = vector.shape_cast %6 : vector<8xf32> to vector<8x1xf32>
    %cst_4 = arith.constant 1.280000e+02 : f32
    %8 = vector.broadcast %cst_4 : f32 to vector<8x1xf32>
    %9 = arith.divf %7, %8 : vector<8x1xf32>
    %10 = vector.broadcast %9 : vector<8x1xf32> to vector<8x128xf32>
    %11 = arith.subf %5, %10 : vector<8x128xf32>
    %12 = arith.mulf %11, %11 : vector<8x128xf32>
    %cst_5 = arith.constant dense<0.000000e+00> : vector<8xf32>
    %13 = vector.multi_reduction <add>, %12, %cst_5 [1] : vector<8x128xf32> to vector<8xf32>
    %14 = vector.shape_cast %13 : vector<8xf32> to vector<8x1xf32>
    %cst_6 = arith.constant 1.280000e+02 : f32
    %15 = vector.broadcast %cst_6 : f32 to vector<8x1xf32>
    %16 = arith.divf %14, %15 : vector<8x1xf32>
    %cst_7 = arith.constant 9.99999974E-6 : f32
    %17 = vector.broadcast %cst_7 : f32 to vector<8x1xf32>
    %18 = arith.addf %16, %17 : vector<8x1xf32>
    %19 = math.rsqrt %18 : vector<8x1xf32>
    %20 = vector.broadcast %19 : vector<8x1xf32> to vector<8x128xf32>
    %21 = arith.mulf %11, %20 : vector<8x128xf32>
    %c0_8 = arith.constant 0 : index
    %c0_9 = arith.constant 0 : index
    %22 = vector.load %arg4[%c0_8, %c0_9] : memref<1x128xf32, #tpu.memory_space<vmem>>, vector<1x128xf32>
    %23 = vector.broadcast %22 : vector<1x128xf32> to vector<8x128xf32>
    %24 = arith.mulf %21, %23 : vector<8x128xf32>
    %c0_10 = arith.constant 0 : index
    %c0_11 = arith.constant 0 : index
    %25 = vector.load %arg5[%c0_10, %c0_11] : memref<1x128xf32, #tpu.memory_space<vmem>>, vector<1x128xf32>
    %26 = vector.broadcast %25 : vector<1x128xf32> to vector<8x128xf32>
    %27 = arith.addf %24, %26 : vector<8x128xf32>
    %28 = arith.truncf %27 : vector<8x128xf32> to vector<8x128xbf16>
    %c0_12 = arith.constant 0 : index
    %c0_13 = arith.constant 0 : index
    %c0_14 = arith.constant 0 : index
    %29 = vector.load %arg6[%c0_12, %c0_13, %c0_14] : memref<1x8x128xbf16, #tpu.memory_space<vmem>>, vector<1x8x128xbf16>
    %30 = vector.shape_cast %29 : vector<1x8x128xbf16> to vector<8x128xbf16>
    %31 = vector.shape_cast %28 : vector<8x128xbf16> to vector<1x8x128xbf16>
    tpu.vector_store %arg6[%c0_12, %c0_13, %c0_14], %31 {strides = array<i32>} : memref<1x8x128xbf16, #tpu.memory_space<vmem>>, vector<1x8x128xbf16>,
    return
  }
  func.func @transform_0(%arg0: i32, %arg1: i32) -> (i32, i32, i32) {
    %c0_i32 = arith.constant 0 : i32
    %c0_i32_0 = arith.constant 0 : i32
    return %arg0, %arg1, %c0_i32 : i32, i32, i32
  }
  func.func @transform_1(%arg0: i32, %arg1: i32) -> (i32, i32) {
    %c0_i32 = arith.constant 0 : i32
    %c0_i32_0 = arith.constant 0 : i32
    return %arg1, %c0_i32 : i32, i32
  }
  func.func @transform_2(%arg0: i32, %arg1: i32) -> (i32, i32) {
    %c0_i32 = arith.constant 0 : i32
    %c0_i32_0 = arith.constant 0 : i32
    %c0_i32_1 = arith.constant 0 : i32
    return %c0_i32, %c0_i32_0 : i32, i32
  }
  func.func @transform_3(%arg0: i32, %arg1: i32) -> (i32, i32) {
    %c0_i32 = arith.constant 0 : i32
    %c0_i32_0 = arith.constant 0 : i32
    %c0_i32_1 = arith.constant 0 : i32
    return %c0_i32, %c0_i32_0 : i32, i32
  }
  func.func @transform_4(%arg0: i32, %arg1: i32) -> (i32, i32, i32) {
    %c0_i32 = arith.constant 0 : i32
    %c0_i32_0 = arith.constant 0 : i32
    return %arg0, %arg1, %c0_i32 : i32, i32, i32
  }
}

module attributes {stable_mosaic.version = 11 : i64} {
  func.func @_linear_kernel(%arg0: i32, %arg1: memref<16x128xbf16, #tpu.memory_space<vmem>>, %arg2: memref<128x384xbf16, #tpu.memory_space<vmem>>, %arg3: memref<1x384xf32, #tpu.memory_space<vmem>>, %arg4: memref<16x384xbf16, #tpu.memory_space<vmem>>) attributes {dimension_semantics = [#tpu.dimension_semantics<parallel>], iteration_bounds = array<i64: 1>, scalar_prefetch = 0 : i64, scratch_operands = 0 : i64, tpu.core_type = #tpu.core_type<tc>, window_params = [{transform_indices = @transform_0, window_bounds = array<i64: 16, 128>}, {pipeline_mode = #tpu.pipeline_mode<synchronous>, transform_indices = @transform_1, window_bounds = array<i64: 128, 384>}, {pipeline_mode = #tpu.pipeline_mode<synchronous>, transform_indices = @transform_2, window_bounds = array<i64: 1, 384>}, {transform_indices = @transform_3, window_bounds = array<i64: 16, 384>}]} {
    %c0 = arith.constant 0 : index
    %c0_0 = arith.constant 0 : index
    %0 = vector.load %arg1[%c0, %c0_0] : memref<16x128xbf16, #tpu.memory_space<vmem>>, vector<16x128xbf16>
    %c0_1 = arith.constant 0 : index
    %c0_2 = arith.constant 0 : index
    %1 = vector.load %arg2[%c0_1, %c0_2] : memref<128x384xbf16, #tpu.memory_space<vmem>>, vector<128x384xbf16>
    %cst = arith.constant dense<0.000000e+00> : vector<16x384xf32>
    %2 = tpu.matmul %0, %1, %cst {dimension_numbers = #tpu.dot_dimension_numbers<[1], [0], [0], [1], [0, 0, 1, 1], [], []>} : vector<16x128xbf16>, vector<128x384xbf16>, vector<16x384xf32> -> vector<16x384xf32>
    %c0_3 = arith.constant 0 : index
    %c0_4 = arith.constant 0 : index
    %3 = vector.load %arg3[%c0_3, %c0_4] : memref<1x384xf32, #tpu.memory_space<vmem>>, vector<1x384xf32>
    %4 = vector.broadcast %3 : vector<1x384xf32> to vector<16x384xf32>
    %5 = arith.addf %2, %4 : vector<16x384xf32>
    %6 = arith.truncf %5 : vector<16x384xf32> to vector<16x384xbf16>
    %c0_5 = arith.constant 0 : index
    %c0_6 = arith.constant 0 : index
    %7 = vector.load %arg4[%c0_5, %c0_6] : memref<16x384xbf16, #tpu.memory_space<vmem>>, vector<16x384xbf16>
    tpu.vector_store %arg4[%c0_5, %c0_6], %6 {strides = array<i32>} : memref<16x384xbf16, #tpu.memory_space<vmem>>, vector<16x384xbf16>,
    return
  }
  func.func @transform_0(%arg0: i32) -> (i32, i32) {
    %c0_i32 = arith.constant 0 : i32
    %c0_i32_0 = arith.constant 0 : i32
    return %arg0, %c0_i32 : i32, i32
  }
  func.func @transform_1(%arg0: i32) -> (i32, i32) {
    %c0_i32 = arith.constant 0 : i32
    %c0_i32_0 = arith.constant 0 : i32
    %c0_i32_1 = arith.constant 0 : i32
    return %c0_i32, %c0_i32_0 : i32, i32
  }
  func.func @transform_2(%arg0: i32) -> (i32, i32) {
    %c0_i32 = arith.constant 0 : i32
    %c0_i32_0 = arith.constant 0 : i32
    %c0_i32_1 = arith.constant 0 : i32
    return %c0_i32, %c0_i32_0 : i32, i32
  }
  func.func @transform_3(%arg0: i32) -> (i32, i32) {
    %c0_i32 = arith.constant 0 : i32
    %c0_i32_0 = arith.constant 0 : i32
    return %arg0, %c0_i32 : i32, i32
  }
}

module attributes {stable_mosaic.version = 11 : i64} {
  func.func @_attn_slab_kernel(%arg0: i32, %arg1: i32, %arg2: memref<1x8x128xbf16, #tpu.memory_space<vmem>>, %arg3: memref<1x8x128xbf16, #tpu.memory_space<vmem>>, %arg4: memref<1x8x128xbf16, #tpu.memory_space<vmem>>, %arg5: memref<1x1x8xf32, #tpu.memory_space<vmem>>, %arg6: memref<1x8x128xbf16, #tpu.memory_space<vmem>>) attributes {dimension_semantics = [#tpu.dimension_semantics<parallel>, #tpu.dimension_semantics<parallel>], iteration_bounds = array<i64: 2, 1>, scalar_prefetch = 0 : i64, scratch_operands = 0 : i64, tpu.core_type = #tpu.core_type<tc>, window_params = [{transform_indices = @transform_0, window_bounds = array<i64: 1, 8, 128>}, {transform_indices = @transform_1, window_bounds = array<i64: 1, 8, 128>}, {transform_indices = @transform_2, window_bounds = array<i64: 1, 8, 128>}, {transform_indices = @transform_3, window_bounds = array<i64: 1, 1, 8>}, {transform_indices = @transform_4, window_bounds = array<i64: 1, 8, 128>}]} {
    %c0 = arith.constant 0 : index
    %c0_0 = arith.constant 0 : index
    %c0_1 = arith.constant 0 : index
    %0 = vector.load %arg5[%c0, %c0_0, %c0_1] : memref<1x1x8xf32, #tpu.memory_space<vmem>>, vector<1x1x8xf32>
    %1 = vector.shape_cast %0 : vector<1x1x8xf32> to vector<1x8xf32>
    %c0_2 = arith.constant 0 : index
    %c0_3 = arith.constant 0 : index
    %c0_4 = arith.constant 0 : index
    %2 = vector.load %arg2[%c0_2, %c0_3, %c0_4] : memref<1x8x128xbf16, #tpu.memory_space<vmem>>, vector<1x8x64xbf16>
    %3 = vector.shape_cast %2 : vector<1x8x64xbf16> to vector<8x64xbf16>
    %c0_5 = arith.constant 0 : index
    %c0_6 = arith.constant 0 : index
    %c0_7 = arith.constant 0 : index
    %4 = vector.load %arg3[%c0_5, %c0_6, %c0_7] : memref<1x8x128xbf16, #tpu.memory_space<vmem>>, vector<1x8x64xbf16>
    %5 = vector.shape_cast %4 : vector<1x8x64xbf16> to vector<8x64xbf16>
    %c0_8 = arith.constant 0 : index
    %c0_9 = arith.constant 0 : index
    %c0_10 = arith.constant 0 : index
    %6 = vector.load %arg4[%c0_8, %c0_9, %c0_10] : memref<1x8x128xbf16, #tpu.memory_space<vmem>>, vector<1x8x64xbf16>
    %7 = vector.shape_cast %6 : vector<1x8x64xbf16> to vector<8x64xbf16>
    %8 = arith.extf %3 : vector<8x64xbf16> to vector<8x64xf32>
    %cst = arith.constant 1.250000e-01 : f32
    %9 = vector.broadcast %cst : f32 to vector<8x64xf32>
    %10 = arith.mulf %8, %9 : vector<8x64xf32>
    %11 = arith.truncf %10 : vector<8x64xf32> to vector<8x64xbf16>
    %cst_11 = arith.constant dense<0.000000e+00> : vector<8x8xf32>
    %12 = tpu.matmul %11, %5, %cst_11 {dimension_numbers = #tpu.dot_dimension_numbers<[1], [1], [0], [0], [0, 0, 1, 0], [], []>} : vector<8x64xbf16>, vector<8x64xbf16>, vector<8x8xf32> -> vector<8x8xf32>
    %13 = vector.broadcast %1 : vector<1x8xf32> to vector<8x8xf32>
    %14 = arith.addf %12, %13 : vector<8x8xf32>
    %cst_12 = arith.constant dense<0xFF800000> : vector<8xf32>
    %15 = vector.multi_reduction <maximumf>, %14, %cst_12 [1] : vector<8x8xf32> to vector<8xf32>
    %16 = vector.shape_cast %15 : vector<8xf32> to vector<8x1xf32>
    %17 = vector.broadcast %16 : vector<8x1xf32> to vector<8x8xf32>
    %18 = arith.subf %14, %17 : vector<8x8xf32>
    %19 = arith.truncf %18 : vector<8x8xf32> to vector<8x8xbf16>
    %20 = math.exp %19 : vector<8x8xbf16>
    %21 = arith.extf %20 : vector<8x8xbf16> to vector<8x8xf32>
    %cst_13 = arith.constant dense<0.000000e+00> : vector<8xf32>
    %22 = vector.multi_reduction <add>, %21, %cst_13 [1] : vector<8x8xf32> to vector<8xf32>
    %23 = vector.shape_cast %22 : vector<8xf32> to vector<8x1xf32>
    %24 = tpu.reciprocal %23 {approx = true} : vector<8x1xf32> -> vector<8x1xf32>
    %25 = arith.truncf %24 : vector<8x1xf32> to vector<8x1xbf16>
    %26 = vector.broadcast %25 : vector<8x1xbf16> to vector<8x8xbf16>
    %27 = arith.mulf %20, %26 : vector<8x8xbf16>
    %cst_14 = arith.constant dense<0.000000e+00> : vector<8x64xf32>
    %28 = tpu.matmul %27, %7, %cst_14 {dimension_numbers = #tpu.dot_dimension_numbers<[1], [0], [0], [1], [0, 0, 1, 1], [], []>} : vector<8x8xbf16>, vector<8x64xbf16>, vector<8x64xf32> -> vector<8x64xf32>
    %29 = arith.truncf %28 : vector<8x64xf32> to vector<8x64xbf16>
    %c0_15 = arith.constant 0 : index
    %c0_16 = arith.constant 0 : index
    %c64 = arith.constant 64 : index
    %30 = vector.load %arg2[%c0_15, %c0_16, %c64] : memref<1x8x128xbf16, #tpu.memory_space<vmem>>, vector<1x8x64xbf16>
    %31 = vector.shape_cast %30 : vector<1x8x64xbf16> to vector<8x64xbf16>
    %c0_17 = arith.constant 0 : index
    %c0_18 = arith.constant 0 : index
    %c64_19 = arith.constant 64 : index
    %32 = vector.load %arg3[%c0_17, %c0_18, %c64_19] : memref<1x8x128xbf16, #tpu.memory_space<vmem>>, vector<1x8x64xbf16>
    %33 = vector.shape_cast %32 : vector<1x8x64xbf16> to vector<8x64xbf16>
    %c0_20 = arith.constant 0 : index
    %c0_21 = arith.constant 0 : index
    %c64_22 = arith.constant 64 : index
    %34 = vector.load %arg4[%c0_20, %c0_21, %c64_22] : memref<1x8x128xbf16, #tpu.memory_space<vmem>>, vector<1x8x64xbf16>
    %35 = vector.shape_cast %34 : vector<1x8x64xbf16> to vector<8x64xbf16>
    %36 = arith.extf %31 : vector<8x64xbf16> to vector<8x64xf32>
    %cst_23 = arith.constant 1.250000e-01 : f32
    %37 = vector.broadcast %cst_23 : f32 to vector<8x64xf32>
    %38 = arith.mulf %36, %37 : vector<8x64xf32>
    %39 = arith.truncf %38 : vector<8x64xf32> to vector<8x64xbf16>
    %cst_24 = arith.constant dense<0.000000e+00> : vector<8x8xf32>
    %40 = tpu.matmul %39, %33, %cst_24 {dimension_numbers = #tpu.dot_dimension_numbers<[1], [1], [0], [0], [0, 0, 1, 0], [], []>} : vector<8x64xbf16>, vector<8x64xbf16>, vector<8x8xf32> -> vector<8x8xf32>
    %41 = vector.broadcast %1 : vector<1x8xf32> to vector<8x8xf32>
    %42 = arith.addf %40, %41 : vector<8x8xf32>
    %cst_25 = arith.constant dense<0xFF800000> : vector<8xf32>
    %43 = vector.multi_reduction <maximumf>, %42, %cst_25 [1] : vector<8x8xf32> to vector<8xf32>
    %44 = vector.shape_cast %43 : vector<8xf32> to vector<8x1xf32>
    %45 = vector.broadcast %44 : vector<8x1xf32> to vector<8x8xf32>
    %46 = arith.subf %42, %45 : vector<8x8xf32>
    %47 = arith.truncf %46 : vector<8x8xf32> to vector<8x8xbf16>
    %48 = math.exp %47 : vector<8x8xbf16>
    %49 = arith.extf %48 : vector<8x8xbf16> to vector<8x8xf32>
    %cst_26 = arith.constant dense<0.000000e+00> : vector<8xf32>
    %50 = vector.multi_reduction <add>, %49, %cst_26 [1] : vector<8x8xf32> to vector<8xf32>
    %51 = vector.shape_cast %50 : vector<8xf32> to vector<8x1xf32>
    %52 = tpu.reciprocal %51 {approx = true} : vector<8x1xf32> -> vector<8x1xf32>
    %53 = arith.truncf %52 : vector<8x1xf32> to vector<8x1xbf16>
    %54 = vector.broadcast %53 : vector<8x1xbf16> to vector<8x8xbf16>
    %55 = arith.mulf %48, %54 : vector<8x8xbf16>
    %cst_27 = arith.constant dense<0.000000e+00> : vector<8x64xf32>
    %56 = tpu.matmul %55, %35, %cst_27 {dimension_numbers = #tpu.dot_dimension_numbers<[1], [0], [0], [1], [0, 0, 1, 1], [], []>} : vector<8x8xbf16>, vector<8x64xbf16>, vector<8x64xf32> -> vector<8x64xf32>
    %57 = arith.truncf %56 : vector<8x64xf32> to vector<8x64xbf16>
    %58 = tpu.concatenate %29, %57 in 1 : vector<8x64xbf16>, vector<8x64xbf16> -> vector<8x128xbf16>
    %c0_28 = arith.constant 0 : index
    %c0_29 = arith.constant 0 : index
    %c0_30 = arith.constant 0 : index
    %59 = vector.load %arg6[%c0_28, %c0_29, %c0_30] : memref<1x8x128xbf16, #tpu.memory_space<vmem>>, vector<1x8x128xbf16>
    %60 = vector.shape_cast %59 : vector<1x8x128xbf16> to vector<8x128xbf16>
    %61 = vector.shape_cast %58 : vector<8x128xbf16> to vector<1x8x128xbf16>
    tpu.vector_store %arg6[%c0_28, %c0_29, %c0_30], %61 {strides = array<i32>} : memref<1x8x128xbf16, #tpu.memory_space<vmem>>, vector<1x8x128xbf16>,
    return
  }
  func.func @transform_0(%arg0: i32, %arg1: i32) -> (i32, i32, i32) {
    %c0_i32 = arith.constant 0 : i32
    %c0_i32_0 = arith.constant 0 : i32
    return %arg0, %c0_i32, %arg1 : i32, i32, i32
  }
  func.func @transform_1(%arg0: i32, %arg1: i32) -> (i32, i32, i32) {
    %c1_i32 = arith.constant 1 : i32
    %0 = arith.addi %c1_i32, %arg1 : i32
    %c0_i32 = arith.constant 0 : i32
    %c0_i32_0 = arith.constant 0 : i32
    return %arg0, %c0_i32, %0 : i32, i32, i32
  }
  func.func @transform_2(%arg0: i32, %arg1: i32) -> (i32, i32, i32) {
    %c2_i32 = arith.constant 2 : i32
    %0 = arith.addi %c2_i32, %arg1 : i32
    %c0_i32 = arith.constant 0 : i32
    %c0_i32_0 = arith.constant 0 : i32
    return %arg0, %c0_i32, %0 : i32, i32, i32
  }
  func.func @transform_3(%arg0: i32, %arg1: i32) -> (i32, i32, i32) {
    %c0_i32 = arith.constant 0 : i32
    %c0_i32_0 = arith.constant 0 : i32
    %c0_i32_1 = arith.constant 0 : i32
    return %arg0, %c0_i32, %c0_i32_0 : i32, i32, i32
  }
  func.func @transform_4(%arg0: i32, %arg1: i32) -> (i32, i32, i32) {
    %c0_i32 = arith.constant 0 : i32
    %c0_i32_0 = arith.constant 0 : i32
    return %arg0, %c0_i32, %arg1 : i32, i32, i32
  }
}

module attributes {stable_mosaic.version = 11 : i64} {
  func.func @_matmul_res_ln_kernel(%arg0: i32, %arg1: memref<16x128xbf16, #tpu.memory_space<vmem>>, %arg2: memref<128x128xbf16, #tpu.memory_space<vmem>>, %arg3: memref<1x128xf32, #tpu.memory_space<vmem>>, %arg4: memref<16x128xbf16, #tpu.memory_space<vmem>>, %arg5: memref<1x128xf32, #tpu.memory_space<vmem>>, %arg6: memref<1x128xf32, #tpu.memory_space<vmem>>, %arg7: memref<16x128xbf16, #tpu.memory_space<vmem>>) attributes {dimension_semantics = [#tpu.dimension_semantics<parallel>], iteration_bounds = array<i64: 1>, scalar_prefetch = 0 : i64, scratch_operands = 0 : i64, tpu.core_type = #tpu.core_type<tc>, window_params = [{transform_indices = @transform_0, window_bounds = array<i64: 16, 128>}, {pipeline_mode = #tpu.pipeline_mode<synchronous>, transform_indices = @transform_1, window_bounds = array<i64: 128, 128>}, {pipeline_mode = #tpu.pipeline_mode<synchronous>, transform_indices = @transform_2, window_bounds = array<i64: 1, 128>}, {transform_indices = @transform_3, window_bounds = array<i64: 16, 128>}, {pipeline_mode = #tpu.pipeline_mode<synchronous>, transform_indices = @transform_4, window_bounds = array<i64: 1, 128>}, {pipeline_mode = #tpu.pipeline_mode<synchronous>, transform_indices = @transform_5, window_bounds = array<i64: 1, 128>}, {transform_indices = @transform_6, window_bounds = array<i64: 16, 128>}]} {
    %c0 = arith.constant 0 : index
    %c0_0 = arith.constant 0 : index
    %0 = vector.load %arg1[%c0, %c0_0] : memref<16x128xbf16, #tpu.memory_space<vmem>>, vector<16x128xbf16>
    %c0_1 = arith.constant 0 : index
    %c0_2 = arith.constant 0 : index
    %1 = vector.load %arg2[%c0_1, %c0_2] : memref<128x128xbf16, #tpu.memory_space<vmem>>, vector<128x128xbf16>
    %cst = arith.constant dense<0.000000e+00> : vector<16x128xf32>
    %2 = tpu.matmul %0, %1, %cst {dimension_numbers = #tpu.dot_dimension_numbers<[1], [0], [0], [1], [0, 0, 1, 1], [], []>} : vector<16x128xbf16>, vector<128x128xbf16>, vector<16x128xf32> -> vector<16x128xf32>
    %c0_3 = arith.constant 0 : index
    %c0_4 = arith.constant 0 : index
    %3 = vector.load %arg3[%c0_3, %c0_4] : memref<1x128xf32, #tpu.memory_space<vmem>>, vector<1x128xf32>
    %4 = vector.broadcast %3 : vector<1x128xf32> to vector<16x128xf32>
    %5 = arith.addf %2, %4 : vector<16x128xf32>
    %c0_5 = arith.constant 0 : index
    %c0_6 = arith.constant 0 : index
    %6 = vector.load %arg4[%c0_5, %c0_6] : memref<16x128xbf16, #tpu.memory_space<vmem>>, vector<16x128xbf16>
    %7 = arith.extf %6 : vector<16x128xbf16> to vector<16x128xf32>
    %8 = arith.addf %5, %7 : vector<16x128xf32>
    %c0_7 = arith.constant 0 : index
    %c0_8 = arith.constant 0 : index
    %9 = vector.load %arg5[%c0_7, %c0_8] : memref<1x128xf32, #tpu.memory_space<vmem>>, vector<1x128xf32>
    %c0_9 = arith.constant 0 : index
    %c0_10 = arith.constant 0 : index
    %10 = vector.load %arg6[%c0_9, %c0_10] : memref<1x128xf32, #tpu.memory_space<vmem>>, vector<1x128xf32>
    %cst_11 = arith.constant dense<0.000000e+00> : vector<16xf32>
    %11 = vector.multi_reduction <add>, %8, %cst_11 [1] : vector<16x128xf32> to vector<16xf32>
    %12 = vector.shape_cast %11 : vector<16xf32> to vector<16x1xf32>
    %cst_12 = arith.constant 1.280000e+02 : f32
    %13 = vector.broadcast %cst_12 : f32 to vector<16x1xf32>
    %14 = arith.divf %12, %13 : vector<16x1xf32>
    %15 = vector.broadcast %14 : vector<16x1xf32> to vector<16x128xf32>
    %16 = arith.subf %8, %15 : vector<16x128xf32>
    %17 = arith.mulf %16, %16 : vector<16x128xf32>
    %cst_13 = arith.constant dense<0.000000e+00> : vector<16xf32>
    %18 = vector.multi_reduction <add>, %17, %cst_13 [1] : vector<16x128xf32> to vector<16xf32>
    %19 = vector.shape_cast %18 : vector<16xf32> to vector<16x1xf32>
    %cst_14 = arith.constant 1.280000e+02 : f32
    %20 = vector.broadcast %cst_14 : f32 to vector<16x1xf32>
    %21 = arith.divf %19, %20 : vector<16x1xf32>
    %cst_15 = arith.constant 9.99999974E-6 : f32
    %22 = vector.broadcast %cst_15 : f32 to vector<16x1xf32>
    %23 = arith.addf %21, %22 : vector<16x1xf32>
    %24 = math.rsqrt %23 : vector<16x1xf32>
    %25 = vector.broadcast %24 : vector<16x1xf32> to vector<16x128xf32>
    %26 = arith.mulf %16, %25 : vector<16x128xf32>
    %27 = vector.broadcast %9 : vector<1x128xf32> to vector<16x128xf32>
    %28 = arith.mulf %26, %27 : vector<16x128xf32>
    %29 = vector.broadcast %10 : vector<1x128xf32> to vector<16x128xf32>
    %30 = arith.addf %28, %29 : vector<16x128xf32>
    %31 = arith.truncf %30 : vector<16x128xf32> to vector<16x128xbf16>
    %c0_16 = arith.constant 0 : index
    %c0_17 = arith.constant 0 : index
    %32 = vector.load %arg7[%c0_16, %c0_17] : memref<16x128xbf16, #tpu.memory_space<vmem>>, vector<16x128xbf16>
    tpu.vector_store %arg7[%c0_16, %c0_17], %31 {strides = array<i32>} : memref<16x128xbf16, #tpu.memory_space<vmem>>, vector<16x128xbf16>,
    return
  }
  func.func @transform_0(%arg0: i32) -> (i32, i32) {
    %c0_i32 = arith.constant 0 : i32
    %c0_i32_0 = arith.constant 0 : i32
    return %arg0, %c0_i32 : i32, i32
  }
  func.func @transform_1(%arg0: i32) -> (i32, i32) {
    %c0_i32 = arith.constant 0 : i32
    %c0_i32_0 = arith.constant 0 : i32
    %c0_i32_1 = arith.constant 0 : i32
    return %c0_i32, %c0_i32_0 : i32, i32
  }
  func.func @transform_2(%arg0: i32) -> (i32, i32) {
    %c0_i32 = arith.constant 0 : i32
    %c0_i32_0 = arith.constant 0 : i32
    %c0_i32_1 = arith.constant 0 : i32
    return %c0_i32, %c0_i32_0 : i32, i32
  }
  func.func @transform_3(%arg0: i32) -> (i32, i32) {
    %c0_i32 = arith.constant 0 : i32
    %c0_i32_0 = arith.constant 0 : i32
    return %arg0, %c0_i32 : i32, i32
  }
  func.func @transform_4(%arg0: i32) -> (i32, i32) {
    %c0_i32 = arith.constant 0 : i32
    %c0_i32_0 = arith.constant 0 : i32
    %c0_i32_1 = arith.constant 0 : i32
    return %c0_i32, %c0_i32_0 : i32, i32
  }
  func.func @transform_5(%arg0: i32) -> (i32, i32) {
    %c0_i32 = arith.constant 0 : i32
    %c0_i32_0 = arith.constant 0 : i32
    %c0_i32_1 = arith.constant 0 : i32
    return %c0_i32, %c0_i32_0 : i32, i32
  }
  func.func @transform_6(%arg0: i32) -> (i32, i32) {
    %c0_i32 = arith.constant 0 : i32
    %c0_i32_0 = arith.constant 0 : i32
    return %arg0, %c0_i32 : i32, i32
  }
}

module attributes {stable_mosaic.version = 11 : i64} {
  func.func @_ffn_ln_kernel(%arg0: i32, %arg1: memref<16x128xbf16, #tpu.memory_space<vmem>>, %arg2: memref<128x512xbf16, #tpu.memory_space<vmem>>, %arg3: memref<1x512xf32, #tpu.memory_space<vmem>>, %arg4: memref<512x128xbf16, #tpu.memory_space<vmem>>, %arg5: memref<1x128xf32, #tpu.memory_space<vmem>>, %arg6: memref<16x128xbf16, #tpu.memory_space<vmem>>, %arg7: memref<1x128xf32, #tpu.memory_space<vmem>>, %arg8: memref<1x128xf32, #tpu.memory_space<vmem>>, %arg9: memref<16x128xbf16, #tpu.memory_space<vmem>>) attributes {dimension_semantics = [#tpu.dimension_semantics<parallel>], iteration_bounds = array<i64: 1>, scalar_prefetch = 0 : i64, scratch_operands = 0 : i64, tpu.core_type = #tpu.core_type<tc>, window_params = [{transform_indices = @transform_0, window_bounds = array<i64: 16, 128>}, {pipeline_mode = #tpu.pipeline_mode<synchronous>, transform_indices = @transform_1, window_bounds = array<i64: 128, 512>}, {pipeline_mode = #tpu.pipeline_mode<synchronous>, transform_indices = @transform_2, window_bounds = array<i64: 1, 512>}, {pipeline_mode = #tpu.pipeline_mode<synchronous>, transform_indices = @transform_3, window_bounds = array<i64: 512, 128>}, {pipeline_mode = #tpu.pipeline_mode<synchronous>, transform_indices = @transform_4, window_bounds = array<i64: 1, 128>}, {transform_indices = @transform_5, window_bounds = array<i64: 16, 128>}, {pipeline_mode = #tpu.pipeline_mode<synchronous>, transform_indices = @transform_6, window_bounds = array<i64: 1, 128>}, {pipeline_mode = #tpu.pipeline_mode<synchronous>, transform_indices = @transform_7, window_bounds = array<i64: 1, 128>}, {transform_indices = @transform_8, window_bounds = array<i64: 16, 128>}]} {
    %c0 = arith.constant 0 : index
    %c0_0 = arith.constant 0 : index
    %0 = vector.load %arg1[%c0, %c0_0] : memref<16x128xbf16, #tpu.memory_space<vmem>>, vector<16x128xbf16>
    %c0_1 = arith.constant 0 : index
    %c0_2 = arith.constant 0 : index
    %1 = vector.load %arg2[%c0_1, %c0_2] : memref<128x512xbf16, #tpu.memory_space<vmem>>, vector<128x512xbf16>
    %cst = arith.constant dense<0.000000e+00> : vector<16x512xf32>
    %2 = tpu.matmul %0, %1, %cst {dimension_numbers = #tpu.dot_dimension_numbers<[1], [0], [0], [1], [0, 0, 1, 1], [], []>} : vector<16x128xbf16>, vector<128x512xbf16>, vector<16x512xf32> -> vector<16x512xf32>
    %c0_3 = arith.constant 0 : index
    %c0_4 = arith.constant 0 : index
    %3 = vector.load %arg3[%c0_3, %c0_4] : memref<1x512xf32, #tpu.memory_space<vmem>>, vector<1x512xf32>
    %4 = vector.broadcast %3 : vector<1x512xf32> to vector<16x512xf32>
    %5 = arith.addf %2, %4 : vector<16x512xf32>
    %6 = arith.truncf %5 : vector<16x512xf32> to vector<16x512xbf16>
    %7 = arith.mulf %6, %6 : vector<16x512xbf16>
    %8 = arith.mulf %6, %7 : vector<16x512xbf16>
    %cst_5 = arith.constant 4.467770e-02 : bf16
    %9 = vector.broadcast %cst_5 : bf16 to vector<16x512xbf16>
    %10 = arith.mulf %9, %8 : vector<16x512xbf16>
    %11 = arith.addf %6, %10 : vector<16x512xbf16>
    %cst_6 = arith.constant 7.968750e-01 : bf16
    %12 = vector.broadcast %cst_6 : bf16 to vector<16x512xbf16>
    %13 = arith.mulf %12, %11 : vector<16x512xbf16>
    %14 = math.tanh %13 : vector<16x512xbf16>
    %cst_7 = arith.constant 1.000000e+00 : bf16
    %15 = vector.broadcast %cst_7 : bf16 to vector<16x512xbf16>
    %16 = arith.addf %15, %14 : vector<16x512xbf16>
    %cst_8 = arith.constant 5.000000e-01 : bf16
    %17 = vector.broadcast %cst_8 : bf16 to vector<16x512xbf16>
    %18 = arith.mulf %17, %16 : vector<16x512xbf16>
    %19 = arith.mulf %6, %18 : vector<16x512xbf16>
    %c0_9 = arith.constant 0 : index
    %c0_10 = arith.constant 0 : index
    %20 = vector.load %arg4[%c0_9, %c0_10] : memref<512x128xbf16, #tpu.memory_space<vmem>>, vector<512x128xbf16>
    %cst_11 = arith.constant dense<0.000000e+00> : vector<16x128xf32>
    %21 = tpu.matmul %19, %20, %cst_11 {dimension_numbers = #tpu.dot_dimension_numbers<[1], [0], [0], [1], [0, 0, 1, 1], [], []>} : vector<16x512xbf16>, vector<512x128xbf16>, vector<16x128xf32> -> vector<16x128xf32>
    %c0_12 = arith.constant 0 : index
    %c0_13 = arith.constant 0 : index
    %22 = vector.load %arg5[%c0_12, %c0_13] : memref<1x128xf32, #tpu.memory_space<vmem>>, vector<1x128xf32>
    %23 = vector.broadcast %22 : vector<1x128xf32> to vector<16x128xf32>
    %24 = arith.addf %21, %23 : vector<16x128xf32>
    %c0_14 = arith.constant 0 : index
    %c0_15 = arith.constant 0 : index
    %25 = vector.load %arg6[%c0_14, %c0_15] : memref<16x128xbf16, #tpu.memory_space<vmem>>, vector<16x128xbf16>
    %26 = arith.extf %25 : vector<16x128xbf16> to vector<16x128xf32>
    %27 = arith.addf %24, %26 : vector<16x128xf32>
    %c0_16 = arith.constant 0 : index
    %c0_17 = arith.constant 0 : index
    %28 = vector.load %arg7[%c0_16, %c0_17] : memref<1x128xf32, #tpu.memory_space<vmem>>, vector<1x128xf32>
    %c0_18 = arith.constant 0 : index
    %c0_19 = arith.constant 0 : index
    %29 = vector.load %arg8[%c0_18, %c0_19] : memref<1x128xf32, #tpu.memory_space<vmem>>, vector<1x128xf32>
    %cst_20 = arith.constant dense<0.000000e+00> : vector<16xf32>
    %30 = vector.multi_reduction <add>, %27, %cst_20 [1] : vector<16x128xf32> to vector<16xf32>
    %31 = vector.shape_cast %30 : vector<16xf32> to vector<16x1xf32>
    %cst_21 = arith.constant 1.280000e+02 : f32
    %32 = vector.broadcast %cst_21 : f32 to vector<16x1xf32>
    %33 = arith.divf %31, %32 : vector<16x1xf32>
    %34 = vector.broadcast %33 : vector<16x1xf32> to vector<16x128xf32>
    %35 = arith.subf %27, %34 : vector<16x128xf32>
    %36 = arith.mulf %35, %35 : vector<16x128xf32>
    %cst_22 = arith.constant dense<0.000000e+00> : vector<16xf32>
    %37 = vector.multi_reduction <add>, %36, %cst_22 [1] : vector<16x128xf32> to vector<16xf32>
    %38 = vector.shape_cast %37 : vector<16xf32> to vector<16x1xf32>
    %cst_23 = arith.constant 1.280000e+02 : f32
    %39 = vector.broadcast %cst_23 : f32 to vector<16x1xf32>
    %40 = arith.divf %38, %39 : vector<16x1xf32>
    %cst_24 = arith.constant 9.99999974E-6 : f32
    %41 = vector.broadcast %cst_24 : f32 to vector<16x1xf32>
    %42 = arith.addf %40, %41 : vector<16x1xf32>
    %43 = math.rsqrt %42 : vector<16x1xf32>
    %44 = vector.broadcast %43 : vector<16x1xf32> to vector<16x128xf32>
    %45 = arith.mulf %35, %44 : vector<16x128xf32>
    %46 = vector.broadcast %28 : vector<1x128xf32> to vector<16x128xf32>
    %47 = arith.mulf %45, %46 : vector<16x128xf32>
    %48 = vector.broadcast %29 : vector<1x128xf32> to vector<16x128xf32>
    %49 = arith.addf %47, %48 : vector<16x128xf32>
    %50 = arith.truncf %49 : vector<16x128xf32> to vector<16x128xbf16>
    %c0_25 = arith.constant 0 : index
    %c0_26 = arith.constant 0 : index
    %51 = vector.load %arg9[%c0_25, %c0_26] : memref<16x128xbf16, #tpu.memory_space<vmem>>, vector<16x128xbf16>
    tpu.vector_store %arg9[%c0_25, %c0_26], %50 {strides = array<i32>} : memref<16x128xbf16, #tpu.memory_space<vmem>>, vector<16x128xbf16>,
    return
  }
  func.func @transform_0(%arg0: i32) -> (i32, i32) {
    %c0_i32 = arith.constant 0 : i32
    %c0_i32_0 = arith.constant 0 : i32
    return %arg0, %c0_i32 : i32, i32
  }
  func.func @transform_1(%arg0: i32) -> (i32, i32) {
    %c0_i32 = arith.constant 0 : i32
    %c0_i32_0 = arith.constant 0 : i32
    %c0_i32_1 = arith.constant 0 : i32
    return %c0_i32, %c0_i32_0 : i32, i32
  }
  func.func @transform_2(%arg0: i32) -> (i32, i32) {
    %c0_i32 = arith.constant 0 : i32
    %c0_i32_0 = arith.constant 0 : i32
    %c0_i32_1 = arith.constant 0 : i32
    return %c0_i32, %c0_i32_0 : i32, i32
  }
  func.func @transform_3(%arg0: i32) -> (i32, i32) {
    %c0_i32 = arith.constant 0 : i32
    %c0_i32_0 = arith.constant 0 : i32
    %c0_i32_1 = arith.constant 0 : i32
    return %c0_i32, %c0_i32_0 : i32, i32
  }
  func.func @transform_4(%arg0: i32) -> (i32, i32) {
    %c0_i32 = arith.constant 0 : i32
    %c0_i32_0 = arith.constant 0 : i32
    %c0_i32_1 = arith.constant 0 : i32
    return %c0_i32, %c0_i32_0 : i32, i32
  }
  func.func @transform_5(%arg0: i32) -> (i32, i32) {
    %c0_i32 = arith.constant 0 : i32
    %c0_i32_0 = arith.constant 0 : i32
    return %arg0, %c0_i32 : i32, i32
  }
  func.func @transform_6(%arg0: i32) -> (i32, i32) {
    %c0_i32 = arith.constant 0 : i32
    %c0_i32_0 = arith.constant 0 : i32
    %c0_i32_1 = arith.constant 0 : i32
    return %c0_i32, %c0_i32_0 : i32, i32
  }
  func.func @transform_7(%arg0: i32) -> (i32, i32) {
    %c0_i32 = arith.constant 0 : i32
    %c0_i32_0 = arith.constant 0 : i32
    %c0_i32_1 = arith.constant 0 : i32
    return %c0_i32, %c0_i32_0 : i32, i32
  }
  func.func @transform_8(%arg0: i32) -> (i32, i32) {
    %c0_i32 = arith.constant 0 : i32
    %c0_i32_0 = arith.constant 0 : i32
    return %arg0, %c0_i32 : i32, i32
  }
}

</mosaic_0001>

<bundles_post_ra>
// kernel: _encoder_forward.1
= control target key start
LH: loop header
LB: loop body
LE: loop exit
PB: predicated region body
PF: predicated region fallthrough
CT: control target
= control target key end

     0   :  { %s453_s15 = smov 0   ;;  %s455_s16 = smov 0   ;;  %s495_s0 = inlined_call_operand.vmem [shape: bf16[2,8,128], index: 0, kind: input, shape index: {}]   ;;  %s496_s1 = inlined_call_operand.vmem [shape: bf16[8,128], index: 1, kind: input, shape index: {}]   ;;  %s497_s2 = inlined_call_operand.vmem [shape: f32[1,128], index: 2, kind: input, shape index: {}]   ;;  %s498_s3 = inlined_call_operand.vmem [shape: f32[1,128], index: 3, kind: input, shape index: {}]   ;;  %s499_s4 = inlined_call_operand.vmem [shape: bf16[2,8,128], index: 4, kind: output, shape index: {}]  }
   0x1   :  { %s457_s17 = smov 0  }
   0x2 LB: > { %s26_s18 = sadd.s32 1, %s422_s16  ;;  %p371_p0 = scmp.ge.s32.totalorder %s426_s17, 1  ;;  %s426_s17 = sphi %s457_s17, %s14_s17   ;;  %s422_s16 = sphi %s455_s16, %s501_s16   ;;  %s418_s15 = sphi %s453_s15, %s500_s15  }
   0x3   : > { %p28_p1 = scmp.ge.s32.totalorder %s26_s18, 2  ;;  %p189_p2 = scmp.lt.s32.totalorder %s426_s17, 3 }
   0x5   : > { %s503_s18 = smov (%p28_p1, %s26_s18), 0  ;;  %p190_p3 = pnand %p371_p0, %p189_p2 }
   0x6   : > { %p223_p4 = scmp.lt.s32.totalorder (!%p190_p3), %s418_s15, 1  ;;  %v243_v0 = vld [vmem:[%s496_s1] sm:$0xf] (!%p190_p3) }
   0x7   : > { %193 = sbr.rel (%p190_p3) target bundleno = 336 (0x150), region = 36  ;;  %v244_v1 = vunpack.c.l.bf16 (!%p190_p3), %v243_v0  ;;  %v374_v13 = vld [vmem:[%s497_s2] ss:$0 sm:$0xff] (!%p190_p3) }
   0x8   : > { %v375_v15 = vld [vmem:[%s498_s3] ss:$0 sm:$0xff] (!%p190_p3) }
   0xe   : > { %s505_s15 = smov (!%p223_p4, %s418_s15), 1 }
   0xf   : > { %s372_s21 = sshll.u32 %s505_s15, 2 }
  0x10   : > { %s229_s24 = scalar_lea.vmem %s495_s0, %s372_s21  ;;  %s240_s5 = scalar_lea.vmem %s499_s4, %s372_s21 }
  0x11   : > { %v241_v2 = vld [vmem:[%s229_s24] sm:$0xf] }
  0x12   : > { %v242_v3 = vunpack.c.l.bf16 %v241_v2 }
  0x14   : > { %v245_v4 = vadd.f32 %v244_v1, %v242_v3 }
  0x16   : > { %246 = vadd.xlane.f32.xlu0 %v245_v4 }
  0xa3   : > { %v247_v5 = vpop.xlane.xlu0 %246 }
  0xa4   : > { %v249_v6 = vmul.f32 0.0078125, %v247_v5 }
  0xa6   : > { %v250_v7 = vsub.f32 %v245_v4, %v249_v6 }
  0xa8   : > { %v251_v8 = vmul.f32 %v250_v7, %v250_v7 }
  0xaa   : > { %252 = vadd.xlane.f32.xlu0 %v251_v8 }
 0x137   : > { %v253_v9 = vpop.xlane.xlu0 %252 }
 0x138   : > { %v254_v10 = vmul.f32 0.0078125, %v253_v9 }
 0x13a   : > { %v255_v11 = vadd.f32 1e-05, %v254_v10 }
 0x13c   : > { %402 = vrsqrt.f32 %v255_v11 }
 0x146   : > { %v403_v12 = vpop.eup %402 }
 0x147   : > { %v257_v14 = vmul.f32 %v403_v12, %v250_v7 }
 0x149   : > { %v265_v16 = vmul.f32 %v374_v13, %v257_v14 }
 0x14b   : > { %v273_v17 = vadd.f32 %v375_v15, %v265_v16 }
 0x14d   : > { %v274_v18 = vpack.c.bf16 %v273_v17, %v273_v17 }
 0x14f   : > { %275 = vst [vmem:[%s240_s5] sm:$0xf] %v274_v18 }
 0x150 PF: > { %s14_s17 = sadd.s32 1, %s426_s17   ;;  %s500_s15 = smov %s422_s16 }
 0x151   : > { %p11_p5 = scmp.ge.s32.totalorder %s14_s17, 4   ;;  %s501_s16 = smov %s503_s18 }
 0x153   :  { %13 = sbr.rel (!%p11_p5) target bundleno = 2 (0x2), region = 69 }

// kernel: closed_call.13
= control target key start
LH: loop header
LB: loop body
LE: loop exit
PB: predicated region body
PF: predicated region fallthrough
CT: control target
= control target key end

     0   :  { %v410_v0 = vmov 0.0   ;;  %vm411_vm0 = vmmov 0   ;;  %v412_v3 = vmov 0   ;;  %v51_v27 = vlaneseq  ;;  %s523_s1 = inlined_call_operand.vmem [shape: bf16[128,384], index: 1, kind: input, shape index: {}]   ;;  %s524_s0 = inlined_call_operand.vmem [shape: bf16[16,128], index: 0, kind: input, shape index: {}]   ;;  %s525_s2 = inlined_call_operand.vmem [shape: f32[1,384], index: 2, kind: input, shape index: {}]   ;;  %s526_s3 = inlined_call_operand.vmem [shape: bf16[16,384], index: 3, kind: output, shape index: {}]  }
   0x1   :  { %354 = vmatprep.subr.bf16.mxu1 %v410_v0  ;;  %v377_v1 = vld [vmem:[%s523_s1 + $0x4] ss:$12 sps:$4 sm:$0xff]   ;;  %370 = vmatprep.mubr.msk.bf16.mxu1 %vm411_vm0, %v410_v0  ;;  %v379_v2 = vld [vmem:[%s523_s1 + $0x8] ss:$12 sps:$4 sm:$0xff]   ;;  %v380_v4 = vld [vmem:[%s523_s1] ss:$12 sps:$4 sm:$0xff]  }
   0x2   :  { %232 = vmatprep.mubr.bf16.mxu0 %v412_v3  ;;  %200 = vmatprep.subr.bf16.mxu0 %v377_v1  ;;  %v381_v5 = vld [vmem:[%s523_s1 + $0x1c] ss:$12 sps:$4 sm:$0xff]   ;;  %v383_v6 = vld [vmem:[%s523_s1 + $0x20] ss:$12 sps:$4 sm:$0xff]   ;;  %v384_v7 = vld [vmem:[%s523_s1 + $0x18] ss:$12 sps:$4 sm:$0xff]  }
   0x3   :  { %355 = vmatpush3.bf16.msra.mxu1 %v379_v2  ;;  %201 = vmatpush1.bf16.msra.mxu0 %v380_v4  ;;  %v385_v8 = vld [vmem:[%s523_s1 + $0x34] ss:$12 sps:$4 sm:$0xff]   ;;  %v387_v9 = vld [vmem:[%s523_s1 + $0x38] ss:$12 sps:$4 sm:$0xff]   ;;  %v388_v10 = vld [vmem:[%s523_s1 + $0x30] ss:$12 sps:$4 sm:$0xff]  }
   0x4   :  { %356 = vmatprep.subr.bf16.mxu1 %v410_v0  ;;  %202 = vmatprep.subr.bf16.mxu0 %v381_v5  ;;  %v389_v11 = vld [vmem:[%s523_s1 + $0x4c] ss:$12 sps:$4 sm:$0xff]   ;;  %v391_v12 = vld [vmem:[%s523_s1 + $0x50] ss:$12 sps:$4 sm:$0xff]   ;;  %v392_v13 = vld [vmem:[%s523_s1 + $0x48] ss:$12 sps:$4 sm:$0xff]  }
   0x5   :  { %v393_v14 = vld [vmem:[%s523_s1 + $0x64] ss:$12 sps:$4 sm:$0xff]   ;;  %v395_v15 = vld [vmem:[%s523_s1 + $0x68] ss:$12 sps:$4 sm:$0xff]   ;;  %v396_v16 = vld [vmem:[%s523_s1 + $0x60] ss:$12 sps:$4 sm:$0xff]  }
   0x6   :  { %v397_v17 = vld [vmem:[%s523_s1 + $0x7c] ss:$12 sps:$4 sm:$0xff]   ;;  %v399_v18 = vld [vmem:[%s523_s1 + $0x80] ss:$12 sps:$4 sm:$0xff]   ;;  %v400_v19 = vld [vmem:[%s523_s1 + $0x78] ss:$12 sps:$4 sm:$0xff]  }
   0x7   :  { %357 = vmatpush3.bf16.msra.mxu1 %v383_v6  ;;  %203 = vmatpush1.bf16.msra.mxu0 %v384_v7  ;;  %v401_v20 = vld [vmem:[%s523_s1 + $0x94] ss:$12 sps:$4 sm:$0xff]   ;;  %v403_v21 = vld [vmem:[%s523_s1 + $0x98] ss:$12 sps:$4 sm:$0xff]   ;;  %v404_v22 = vld [vmem:[%s523_s1 + $0x90] ss:$12 sps:$4 sm:$0xff]  }
   0x8   :  { %358 = vmatprep.subr.bf16.mxu1 %v410_v0  ;;  %204 = vmatprep.subr.bf16.mxu0 %v385_v8  ;;  %v405_v23 = vld [vmem:[%s523_s1 + $0xac] ss:$12 sps:$4 sm:$0xff]   ;;  %v407_v24 = vld [vmem:[%s523_s1 + $0xb0] ss:$12 sps:$4 sm:$0xff]   ;;  %v408_v25 = vld [vmem:[%s523_s1 + $0xa8] ss:$12 sps:$4 sm:$0xff]  }
   0x9   :  { %v409_v26 = vld [vmem:[%s524_s0] sm:$0xff]   ;;  %v52_v28 = vshrl.u32 %v51_v27, 7 }
   0xa   :  { %v49_v30 = vld [vmem:[%s525_s2] sm:$0x7] }
   0xb   :  { %359 = vmatpush3.bf16.msra.mxu1 %v387_v9  ;;  %205 = vmatpush1.bf16.msra.mxu0 %v388_v10  ;;  %v61_v29 = vsub.s32 2, %v52_v28  ;;  %v53_v31 = vsub.s32 0, %v52_v28  ;;  %v57_v32 = vsub.s32 1, %v52_v28 }
   0xc   :  { %360 = vmatprep.subr.bf16.mxu1 %v410_v0  ;;  %206 = vmatprep.subr.bf16.mxu0 %v389_v11 }
   0xd   :  { %v62_v33 = vrot.slane %v49_v30, %v61_v29  ;;  %v54_v34 = vrot.slane %v49_v30, %v53_v31  ;;  %v58_v35 = vrot.slane %v49_v30, %v57_v32 }
   0xf   :  { %361 = vmatpush3.bf16.msra.mxu1 %v391_v12  ;;  %207 = vmatpush1.bf16.msra.mxu0 %v392_v13 }
  0x10   :  { %362 = vmatprep.subr.bf16.mxu1 %v410_v0  ;;  %208 = vmatprep.subr.bf16.mxu0 %v393_v14 }
  0x13   :  { %363 = vmatpush3.bf16.msra.mxu1 %v395_v15  ;;  %209 = vmatpush1.bf16.msra.mxu0 %v396_v16 }
  0x14   :  { %364 = vmatprep.subr.bf16.mxu1 %v410_v0  ;;  %210 = vmatprep.subr.bf16.mxu0 %v397_v17 }
  0x17   :  { %365 = vmatpush3.bf16.msra.mxu1 %v399_v18  ;;  %211 = vmatpush1.bf16.msra.mxu0 %v400_v19 }
  0x18   :  { %366 = vmatprep.subr.bf16.mxu1 %v410_v0  ;;  %212 = vmatprep.subr.bf16.mxu0 %v401_v20 }
  0x1b   :  { %367 = vmatpush3.bf16.msra.mxu1 %v403_v21  ;;  %213 = vmatpush1.bf16.msra.mxu0 %v404_v22 }
  0x1c   :  { %368 = vmatprep.subr.bf16.mxu1 %v410_v0  ;;  %214 = vmatprep.subr.bf16.mxu0 %v405_v23 }
  0x1f   :  { %369 = vmatpush3.bf16.msra.mxu1 %v407_v24  ;;  %215 = vmatpush1.bf16.msra.mxu0 %v408_v25 }
  0x22   :  { %371 = vmatmul.mubr.bf16.vlgmr.msra.gmra.mrb[0].mxu1 %v409_v26  ;;  %233 = vmatmul.mubr.bf16.vlgmr.msra.gmra.mrb[0].mxu0 %v409_v26 }
  0xf5   :  { %v277_v36 = vpop.f32.mrb[0].mxu1  ;;  %v234_v38 = vpop.f32.mrb[0].mxu0 }
  0xf6   :  { %v278_v37 = vadd.f32 %v277_v36, %v62_v33  ;;  %v372_v39 = vpop.f32.mrb[1].mxu1  ;;  %v235_v40 = vadd.f32 %v234_v38, %v54_v34  ;;  %v236_v41 = vpop.f32.mrb[1].mxu0 }
  0xf7   :  { %v280_v42 = vpop.f32.mrb[2].mxu1  ;;  %v237_v44 = vadd.f32 %v236_v41, %v58_v35  ;;  %v238_v46 = vpop.f32.mrb[2].mxu0 }
  0xf8   :  { %v342_v43 = vpack.c.bf16 %v278_v37, %v278_v37  ;;  %v281_v45 = vadd.f32 %v280_v42, %v62_v33  ;;  %v373_v47 = vpop.f32.mrb[3].mxu1  ;;  %v239_v48 = vadd.f32 %v238_v46, %v54_v34  ;;  %v240_v49 = vpop.f32.mrb[3].mxu0 }
  0xf9   :  { %v341_v50 = vpack.c.bf16 %v237_v44, %v235_v40  ;;  %v241_v52 = vadd.f32 %v240_v49, %v58_v35 }
  0xfa   :  { %305 = vst [vmem:[%s526_s3 + $0x8] sm:$0xf] %v342_v43  ;;  %v344_v51 = vpack.c.bf16 %v281_v45, %v281_v45 }
  0xfb   :  { %304 = vst [vmem:[%s526_s3] sm:$0xff] %v341_v50  ;;  %v343_v53 = vpack.c.bf16 %v241_v52, %v239_v48 }
  0xfc   :  { %307 = vst [vmem:[%s526_s3 + $0x14] sm:$0xf] %v344_v51 }
  0xfd   :  { %306 = vst [vmem:[%s526_s3 + $0xc] sm:$0xff] %v343_v53 }

// kernel: closed_call.14
= control target key start
LH: loop header
LB: loop body
LE: loop exit
PB: predicated region body
PF: predicated region fallthrough
CT: control target
= control target key end

     0   :  { %s839_s15 = smov 0   ;;  %s841_s16 = smov 0   ;;  %s912_s0 = inlined_call_operand.vmem [shape: bf16[2,8,384], index: 0, kind: input, shape index: {}, may-alias: {0,1,2}]   ;;  %s913_s1 = inlined_call_operand.vmem [shape: bf16[2,8,384], index: 1, kind: input, shape index: {}, may-alias: {0,1,2}]   ;;  %s914_s2 = inlined_call_operand.vmem [shape: bf16[2,8,384], index: 2, kind: input, shape index: {}, may-alias: {0,1,2}]   ;;  %s915_s3 = inlined_call_operand.vmem [shape: f32[2,1,8], index: 3, kind: input, shape index: {}]   ;;  %s916_s4 = inlined_call_operand.vmem [shape: bf16[2,8,128], index: 4, kind: output, shape index: {}]  }
   0x1   :  { %s843_s17 = smov 0  }
   0x2 LB: > { %s26_s18 = sadd.s32 1, %s805_s16  ;;  %p697_p0 = scmp.ge.s32.totalorder %s809_s17, 1  ;;  %s809_s17 = sphi %s843_s17, %s14_s17   ;;  %s805_s16 = sphi %s841_s16, %s918_s16   ;;  %s801_s15 = sphi %s839_s15, %s917_s15  }
   0x3   : > { %p28_p1 = scmp.ge.s32.totalorder %s26_s18, 2  ;;  %p227_p2 = scmp.lt.s32.totalorder %s809_s17, 3 }
   0x5   : > { %s920_s18 = smov (%p28_p1, %s26_s18), 0  ;;  %p228_p3 = pnand %p697_p0, %p227_p2 }
   0x6   : > { %p279_p4 = scmp.lt.s32.totalorder (!%p228_p3), %s801_s15, 1  ;;  %v811_v0 = vmov (!%p228_p3), 0.0   ;;  %vm812_vm0 = vmmov (!%p228_p3), 0   ;;  %vm331_vm1 = vcmask (!%p228_p3), 523264   ;;  %vm378_vm2 = vcmask (!%p228_p3), 64512   ;;  %s813_s30 = smov (!%p228_p3), 64  }
   0x7   : > { %231 = sbr.rel (%p228_p3) target bundleno = 1437 (0x59d), region = 36  ;;  %723 = vmatprep.subr.bf16.mxu0 (!%p228_p3), %v811_v0  ;;  %725 = vmatprep.mubr.msk.bf16.mxu0 (!%p228_p3), %vm812_vm0, %v811_v0  ;;  %vm397_vm3 = vcmask (!%p228_p3), 1043456  }
   0x8   : > { %729 = vmatprep.subr.bf16.mxu1 (!%p228_p3), %v811_v0  ;;  %731 = vmatprep.mubr.msk.bf16.mxu1 (!%p228_p3), %vm812_vm0, %v811_v0 }
   0xe   : > { %s922_s15 = smov (!%p279_p4, %s801_s15), 1 }
   0xf   : > { %s862_s19 = smul.u32 12, %s922_s15  ;;  %s309_s29 = scalar_lea.vmem %s915_s3, %s922_s15 }
  0x10   : > { %v702_v7 = vld [vmem:[%s309_s29] ss:$0 sm:$0xff]  ;;  %s701_s9 = sshll.u32 %s922_s15, 2 }
  0x11   : > { %s712_s20 = sadd.s32 4, %s862_s19  ;;  %s286_s23 = scalar_lea.vmem %s912_s0, %s862_s19 }
  0x12   : > { %s295_s26 = scalar_lea.vmem %s913_s1, %s712_s20  ;;  %v319_v1 = vld [vmem:[%s286_s23] sm:$0xf]  ;;  %s714_s5 = sadd.s32 8, %s862_s19 }
  0x13   : > { %v320_v2 = vld [vmem:[%s295_s26] sm:$0xf]  ;;  %v322_v3 = vunpack.c.l.bf16 %v319_v1  ;;  %s305_s8 = scalar_lea.vmem %s914_s2, %s714_s5  ;;  %s316_s12 = scalar_lea.vmem %s916_s4, %s701_s9 }
  0x14   : > { %v336_v4 = vsel %vm331_vm1, %v320_v2, 0  ;;  %v705_v14 = vcombine.low %v320_v2, %v320_v2  ;;  %v321_v22 = vld [vmem:[%s305_s8] sm:$0xf] }
  0x15   : > { %724 = vmatpush3.bf16.xpose.msra.mxu0 %v336_v4  ;;  %v323_v5 = vmul.f32 0.125, %v322_v3  ;;  %v399_v23 = vsel %vm397_vm3, %v321_v22, 0  ;;  %v707_v41 = vcombine.low %v321_v22, %v321_v22 }
  0x16   : > { %741 = vmatprep.subr.bf16.mxu0 %v811_v0  ;;  %448 = vrot.lane.b32.xlu1 %v705_v14, %s813_s30 }
  0x17   : > { %v324_v6 = vpack.c.bf16 %v323_v5, %v323_v5  ;;  %730 = vmatpush3.bf16.msra.mxu1 %v399_v23 }
  0x18   : > { %735 = vmatprep.subr.bf16.mxu1 %v811_v0 }
  0x1a   : > { %443 = vrot.lane.b32.xlu1 %v324_v6, %s813_s30 }
  0x1c   : > { %726 = vmatmul.mubr.msk.bf16.vlgmr.msra.gmra.mrb[0].mxu0 %vm331_vm1, %v324_v6 }
  0x1d   : > { %743 = vmatprep.mubr.msk.bf16.mxu0 %vm812_vm0, %v811_v0 }
  0x88   : > { %v449_v26 = vpop.permute.xlu1 %448 }
  0x89   : > { %v454_v29 = vsel %vm331_vm1, %v449_v26, 0 }
  0x8c   : > { %v444_v30 = vpop.permute.xlu1 %443 }
  0xef   : > { %v372_v8 = vpop.f32.mrb[0].mxu0 }
  0xf0   : > { %v373_v9 = vadd.f32 %v702_v7, %v372_v8  ;;  %v727_v10 = vpop.f32.mrb[1].mxu0 }
  0xf1   : > { %v375_v11 = vpop.f32.mrb[2].mxu0 }
  0xf2   : > { %v728_v12 = vpop.f32.mrb[3].mxu0  ;;  %v379_v13 = vsel %vm378_vm2, %v373_v9, -inf }
  0xf3   : > { %380 = vmax.xlane.f32.xlu0 %v379_v13 }
 0x180   : > { %v381_v15 = vpop.xlane.xlu0 %380 }
 0x181   : > { %v382_v16 = vsub.f32 %v373_v9, %v381_v15 }
 0x183   : > { %v383_v17 = vpack.c.bf16 %v382_v16, %v382_v16 }
 0x185   : > { %v385_v18 = vmul.bf16 1069105081, %v383_v17 }
 0x187   : > { %779 = vpow.bf16 %v385_v18 }
 0x192   : > { %v780_v19 = vpop.eup %779 }
 0x193   : > { %v387_v20 = vunpack.c.l.bf16 %v780_v19 }
 0x195   : > { %v388_v21 = vsel %vm378_vm2, %v387_v20, 0.0 }
 0x196   : > { %389 = vadd.xlane.f32.xlu0 %v388_v21 }
 0x223   : > { %v390_v24 = vpop.xlane.xlu0 %389 }
 0x224   : > { %781 = vrcp.f32 %v390_v24 }
 0x22e   : > { %v782_v25 = vpop.eup %781 }
 0x22f   : > { %v392_v27 = vpack.c.bf16 %v782_v25, %v782_v25 }
 0x231   : > { %v393_v28 = vmul.bf16 %v780_v19, %v392_v27 }
 0x233   : > { %732 = vmatmul.mubr.msk.bf16.vlgmr.msra.gmra.mrb[0].mxu1 %vm378_vm2, %v393_v28 }
 0x234   : > { %736 = vmatpush3.bf16.xpose.msra.mxu1 %v454_v29  ;;  %737 = vmatprep.mubr.msk.bf16.mxu1 %vm812_vm0, %v811_v0 }
 0x23b   : > { %738 = vmatmul.mubr.msk.bf16.vlgmr.msra.gmra.mrb[4].mxu1 %vm331_vm1, %v444_v30 }
 0x306   : > { %v435_v31 = vpop.f32.mrb[0].mxu1 }
 0x307   : > { %v733_v32 = vpop.f32.mrb[1].mxu1  ;;  %v441_v60 = vpack.c.bf16 %v435_v31, %v435_v31 }
 0x308   : > { %v438_v33 = vpop.f32.mrb[2].mxu1 }
 0x309   : > { %v734_v34 = vpop.f32.mrb[3].mxu1 }
 0x30e   : > { %v490_v35 = vpop.f32.mrb[4].mxu1 }
 0x30f   : > { %v491_v36 = vadd.f32 %v702_v7, %v490_v35  ;;  %v739_v37 = vpop.f32.mrb[5].mxu1 }
 0x310   : > { %v493_v38 = vpop.f32.mrb[6].mxu1 }
 0x311   : > { %v740_v39 = vpop.f32.mrb[7].mxu1  ;;  %v496_v40 = vsel %vm378_vm2, %v491_v36, -inf }
 0x312   : > { %497 = vmax.xlane.f32.xlu0 %v496_v40 }
 0x328   : > { %514 = vrot.lane.b32.xlu0 %v707_v41, %s813_s30 }
 0x39f   : > { %v498_v42 = vpop.xlane.xlu0 %497 }
 0x3a0   : > { %v499_v43 = vsub.f32 %v491_v36, %v498_v42 }
 0x3a2   : > { %v500_v44 = vpack.c.bf16 %v499_v43, %v499_v43 }
 0x3a3   : > { %v515_v49 = vpop.permute.xlu0 %514 }
 0x3a4   : > { %v502_v45 = vmul.bf16 1069105081, %v500_v44  ;;  %v520_v50 = vsel %vm397_vm3, %v515_v49, 0 }
 0x3a5   : > { %742 = vmatpush3.bf16.msra.mxu0 %v520_v50 }
 0x3a6   : > { %783 = vpow.bf16 %v502_v45 }
 0x3b1   : > { %v784_v46 = vpop.eup %783 }
 0x3b2   : > { %v504_v47 = vunpack.c.l.bf16 %v784_v46 }
 0x3b4   : > { %v505_v48 = vsel %vm378_vm2, %v504_v47, 0.0 }
 0x3b5   : > { %506 = vadd.xlane.f32.xlu1 %v505_v48 }
 0x442   : > { %v507_v51 = vpop.xlane.xlu1 %506 }
 0x443   : > { %785 = vrcp.f32 %v507_v51 }
 0x44d   : > { %v786_v52 = vpop.eup %785 }
 0x44e   : > { %v509_v53 = vpack.c.bf16 %v786_v52, %v786_v52 }
 0x450   : > { %v510_v54 = vmul.bf16 %v784_v46, %v509_v53 }
 0x452   : > { %744 = vmatmul.mubr.msk.bf16.vlgmr.msra.gmra.mrb[4].mxu0 %vm378_vm2, %v510_v54 }
 0x525   : > { %v556_v55 = vpop.f32.mrb[4].mxu0 }
 0x526   : > { %v562_v56 = vpack.c.bf16 %v556_v55, %v556_v55  ;;  %v745_v57 = vpop.f32.mrb[5].mxu0 }
 0x527   : > { %v559_v58 = vpop.f32.mrb[6].mxu0 }
 0x528   : > { %564 = vrot.lane.b32.xlu0 %v562_v56, %s813_s30  ;;  %v746_v59 = vpop.f32.mrb[7].mxu0 }
 0x59a   : > { %v565_v61 = vpop.permute.xlu0 %564 }
 0x59b   : > { %v568_v62 = vsel %vm331_vm1, %v441_v60, %v565_v61 }
 0x59c   : > { %570 = vst [vmem:[%s316_s12] sm:$0xf] %v568_v62 }
 0x59d PF: > { %s14_s17 = sadd.s32 1, %s809_s17   ;;  %s917_s15 = smov %s805_s16 }
 0x59e   : > { %p11_p5 = scmp.ge.s32.totalorder %s14_s17, 4   ;;  %s918_s16 = smov %s920_s18 }
 0x5a0   :  { %13 = sbr.rel (!%p11_p5) target bundleno = 2 (0x2), region = 75 }

// kernel: closed_call.15
= control target key start
LH: loop header
LB: loop body
LE: loop exit
PB: predicated region body
PF: predicated region fallthrough
CT: control target
= control target key end

     0   :  { %v274_v0 = vmov 0.0   ;;  %vm275_vm0 = vmmov 0   ;;  %s353_s1 = inlined_call_operand.vmem [shape: bf16[128,128], index: 1, kind: input, shape index: {}]   ;;  %s354_s0 = inlined_call_operand.vmem [shape: bf16[16,128], index: 0, kind: input, shape index: {}]   ;;  %s355_s3 = inlined_call_operand.vmem [shape: bf16[16,128], index: 3, kind: input, shape index: {}]   ;;  %s356_s2 = inlined_call_operand.vmem [shape: f32[1,128], index: 2, kind: input, shape index: {}]   ;;  %s357_s4 = inlined_call_operand.vmem [shape: f32[1,128], index: 4, kind: input, shape index: {}]   ;;  %s358_s5 = inlined_call_operand.vmem [shape: f32[1,128], index: 5, kind: input, shape index: {}]   ;;  %s359_s6 = inlined_call_operand.vmem [shape: bf16[16,128], index: 6, kind: output, shape index: {}]  }
   0x1   :  { %239 = vmatprep.subr.bf16.mxu0 %v274_v0  ;;  %v261_v1 = vld [vmem:[%s353_s1] sm:$0xff]   ;;  %255 = vmatprep.mubr.msk.bf16.mxu0 %vm275_vm0, %v274_v0  ;;  %v262_v2 = vld [vmem:[%s353_s1 + $0x8] sm:$0xff]   ;;  %v263_v3 = vld [vmem:[%s353_s1 + $0x10] sm:$0xff]  }
   0x2   :  { %240 = vmatpush3.bf16.msra.mxu0 %v261_v1  ;;  %v264_v4 = vld [vmem:[%s353_s1 + $0x18] sm:$0xff]   ;;  %v265_v5 = vld [vmem:[%s353_s1 + $0x20] sm:$0xff]   ;;  %v266_v6 = vld [vmem:[%s353_s1 + $0x28] sm:$0xff]  }
   0x3   :  { %241 = vmatprep.subr.bf16.mxu0 %v274_v0  ;;  %v267_v7 = vld [vmem:[%s353_s1 + $0x30] sm:$0xff]   ;;  %v268_v8 = vld [vmem:[%s353_s1 + $0x38] sm:$0xff]   ;;  %v269_v9 = vld [vmem:[%s354_s0] sm:$0xff]  }
   0x4   :  { %v222_v10 = vld [vmem:[%s355_s3] sm:$0xff]  }
   0x5   :  { %v205_v11 = vld [vmem:[%s356_s2] ss:$0 sm:$0xff]  ;;  %v223_v12 = vunpack.c.l.bf16 %v222_v10  ;;  %v224_v20 = vunpack.c.h.bf16 %v222_v10 }
   0x6   :  { %242 = vmatpush3.bf16.msra.mxu0 %v262_v2  ;;  %v215_v38 = vld [vmem:[%s357_s4] ss:$0 sm:$0xff] }
   0x7   :  { %243 = vmatprep.subr.bf16.mxu0 %v274_v0  ;;  %v216_v42 = vld [vmem:[%s358_s5] ss:$0 sm:$0xff] }
   0xa   :  { %244 = vmatpush3.bf16.msra.mxu0 %v263_v3 }
   0xb   :  { %245 = vmatprep.subr.bf16.mxu0 %v274_v0 }
   0xe   :  { %246 = vmatpush3.bf16.msra.mxu0 %v264_v4 }
   0xf   :  { %247 = vmatprep.subr.bf16.mxu0 %v274_v0 }
  0x12   :  { %248 = vmatpush3.bf16.msra.mxu0 %v265_v5 }
  0x13   :  { %249 = vmatprep.subr.bf16.mxu0 %v274_v0 }
  0x16   :  { %250 = vmatpush3.bf16.msra.mxu0 %v266_v6 }
  0x17   :  { %251 = vmatprep.subr.bf16.mxu0 %v274_v0 }
  0x1a   :  { %252 = vmatpush3.bf16.msra.mxu0 %v267_v7 }
  0x1b   :  { %253 = vmatprep.subr.bf16.mxu0 %v274_v0 }
  0x1e   :  { %254 = vmatpush3.bf16.msra.mxu0 %v268_v8 }
  0x21   :  { %256 = vmatmul.mubr.bf16.vlgmr.msra.gmra.mrb[0].mxu0 %v269_v9 }
  0xf4   :  { %v137_v13 = vpop.f32.mrb[0].mxu0 }
  0xf5   :  { %v138_v14 = vadd.f32 %v205_v11, %v137_v13  ;;  %v257_v15 = vpop.f32.mrb[1].mxu0 }
  0xf6   :  { %v140_v16 = vpop.f32.mrb[2].mxu0 }
  0xf7   :  { %v141_v17 = vadd.f32 %v205_v11, %v140_v16  ;;  %v258_v18 = vpop.f32.mrb[3].mxu0  ;;  %v148_v19 = vadd.f32 %v223_v12, %v138_v14 }
  0xf9   :  { %152 = vadd.xlane.f32.xlu0 %v148_v19  ;;  %v149_v21 = vadd.f32 %v224_v20, %v141_v17 }
  0xfd   :  { %154 = vadd.xlane.f32.xlu0 %v149_v21 }
 0x186   :  { %v153_v22 = vpop.xlane.xlu0 %152 }
 0x187   :  { %v157_v23 = vmul.f32 0.0078125, %v153_v22 }
 0x189   :  { %v159_v24 = vsub.f32 %v148_v19, %v157_v23 }
 0x18a   :  { %v155_v25 = vpop.xlane.xlu0 %154 }
 0x18b   :  { %v158_v26 = vmul.f32 0.0078125, %v155_v25  ;;  %v161_v27 = vmul.f32 %v159_v24, %v159_v24 }
 0x18d   :  { %v160_v28 = vsub.f32 %v149_v21, %v158_v26  ;;  %163 = vadd.xlane.f32.xlu1 %v161_v27 }
 0x18f   :  { %v162_v29 = vmul.f32 %v160_v28, %v160_v28 }
 0x191   :  { %165 = vadd.xlane.f32.xlu1 %v162_v29 }
 0x21a   :  { %v164_v30 = vpop.xlane.xlu1 %163 }
 0x21b   :  { %v167_v31 = vmul.f32 0.0078125, %v164_v30 }
 0x21d   :  { %v169_v32 = vadd.f32 1e-05, %v167_v31 }
 0x21e   :  { %v166_v33 = vpop.xlane.xlu1 %165 }
 0x21f   :  { %270 = vrsqrt.f32 %v169_v32  ;;  %v168_v34 = vmul.f32 0.0078125, %v166_v33 }
 0x221   :  { %v170_v35 = vadd.f32 1e-05, %v168_v34 }
 0x223   :  { %272 = vrsqrt.f32 %v170_v35 }
 0x229   :  { %v271_v36 = vpop.eup %270 }
 0x22a   :  { %v173_v37 = vmul.f32 %v271_v36, %v159_v24 }
 0x22c   :  { %v181_v40 = vmul.f32 %v215_v38, %v173_v37 }
 0x22d   :  { %v273_v39 = vpop.eup %272 }
 0x22e   :  { %v174_v41 = vmul.f32 %v273_v39, %v160_v28  ;;  %v189_v44 = vadd.f32 %v216_v42, %v181_v40 }
 0x230   :  { %v182_v43 = vmul.f32 %v215_v38, %v174_v41 }
 0x232   :  { %v190_v45 = vadd.f32 %v216_v42, %v182_v43 }
 0x234   :  { %v228_v46 = vpack.c.bf16 %v190_v45, %v189_v44 }
 0x236   :  { %229 = vst [vmem:[%s359_s6] sm:$0xff] %v228_v46  }

// kernel: closed_call.16
= control target key start
LH: loop header
LB: loop body
LE: loop exit
PB: predicated region body
PF: predicated region fallthrough
CT: control target
= control target key end

     0   :  { %v1007_v1 = vmov 0   ;;  %s1266_s1 = inlined_call_operand.vmem [shape: bf16[128,512], index: 1, kind: input, shape index: {}]   ;;  %s1267_s0 = inlined_call_operand.vmem [shape: bf16[16,128], index: 0, kind: input, shape index: {}, may-alias: {0,5}]   ;;  %s1268_s3 = inlined_call_operand.vmem [shape: bf16[512,128], index: 3, kind: input, shape index: {}]   ;;  %s1269_s2 = inlined_call_operand.vmem [shape: f32[1,512], index: 2, kind: input, shape index: {}]   ;;  %s1270_s4 = inlined_call_operand.vmem [shape: f32[1,128], index: 4, kind: input, shape index: {}]   ;;  %s1271_s5 = inlined_call_operand.vmem [shape: bf16[16,128], index: 5, kind: input, shape index: {}, may-alias: {0,5}]   ;;  %s1272_s6 = inlined_call_operand.vmem [shape: f32[1,128], index: 6, kind: input, shape index: {}]   ;;  %s1273_s7 = inlined_call_operand.vmem [shape: f32[1,128], index: 7, kind: input, shape index: {}]   ;;  %s1274_s8 = inlined_call_operand.vmem [shape: bf16[16,128], index: 8, kind: output, shape index: {}]  }
   0x1   :  { %v914_v0 = vld [vmem:[%s1266_s1 + $0x4] ss:$16 sps:$4 sm:$0xff]   ;;  %288 = vmatprep.mubr.bf16.mxu0 %v1007_v1  ;;  %331 = vmatprep.mubr.bf16.mxu1 %v1007_v1  ;;  %v916_v2 = vld [vmem:[%s1266_s1 + $0xc] ss:$16 sps:$4 sm:$0xff]   ;;  %v918_v3 = vld [vmem:[%s1266_s1] ss:$16 sps:$4 sm:$0xff]  }
   0x2   :  { %256 = vmatprep.subr.bf16.mxu0 %v914_v0  ;;  %v919_v4 = vld [vmem:[%s1266_s1 + $0x8] ss:$16 sps:$4 sm:$0xff]   ;;  %299 = vmatprep.subr.bf16.mxu1 %v916_v2  ;;  %v920_v5 = vld [vmem:[%s1266_s1 + $0x24] ss:$16 sps:$4 sm:$0xff]   ;;  %v922_v6 = vld [vmem:[%s1266_s1 + $0x2c] ss:$16 sps:$4 sm:$0xff]   ;;  %v70_v2 = vlaneseq }
   0x3   :  { %257 = vmatpush1.bf16.msra.mxu0 %v918_v3  ;;  %300 = vmatpush1.bf16.msra.mxu1 %v919_v4  ;;  %v924_v7 = vld [vmem:[%s1266_s1 + $0x20] ss:$16 sps:$4 sm:$0xff]   ;;  %v925_v8 = vld [vmem:[%s1266_s1 + $0x28] ss:$16 sps:$4 sm:$0xff]   ;;  %v926_v9 = vld [vmem:[%s1266_s1 + $0x44] ss:$16 sps:$4 sm:$0xff]  }
   0x4   :  { %258 = vmatprep.subr.bf16.mxu0 %v920_v5  ;;  %301 = vmatprep.subr.bf16.mxu1 %v922_v6  ;;  %v928_v10 = vld [vmem:[%s1266_s1 + $0x4c] ss:$16 sps:$4 sm:$0xff]   ;;  %v930_v11 = vld [vmem:[%s1266_s1 + $0x40] ss:$16 sps:$4 sm:$0xff]   ;;  %v931_v12 = vld [vmem:[%s1266_s1 + $0x48] ss:$16 sps:$4 sm:$0xff]  }
   0x5   :  { %v932_v13 = vld [vmem:[%s1266_s1 + $0x64] ss:$16 sps:$4 sm:$0xff]   ;;  %v934_v14 = vld [vmem:[%s1266_s1 + $0x6c] ss:$16 sps:$4 sm:$0xff]   ;;  %v936_v15 = vld [vmem:[%s1266_s1 + $0x60] ss:$16 sps:$4 sm:$0xff]  }
   0x6   :  { %v937_v16 = vld [vmem:[%s1266_s1 + $0x68] ss:$16 sps:$4 sm:$0xff]   ;;  %v938_v17 = vld [vmem:[%s1266_s1 + $0x84] ss:$16 sps:$4 sm:$0xff]   ;;  %v940_v18 = vld [vmem:[%s1266_s1 + $0x8c] ss:$16 sps:$4 sm:$0xff]  }
   0x7   :  { %259 = vmatpush1.bf16.msra.mxu0 %v924_v7  ;;  %302 = vmatpush1.bf16.msra.mxu1 %v925_v8  ;;  %v942_v19 = vld [vmem:[%s1266_s1 + $0x80] ss:$16 sps:$4 sm:$0xff]   ;;  %v943_v20 = vld [vmem:[%s1266_s1 + $0x88] ss:$16 sps:$4 sm:$0xff]   ;;  %v944_v21 = vld [vmem:[%s1266_s1 + $0xa4] ss:$16 sps:$4 sm:$0xff]  }
   0x8   :  { %260 = vmatprep.subr.bf16.mxu0 %v926_v9  ;;  %303 = vmatprep.subr.bf16.mxu1 %v928_v10  ;;  %v946_v22 = vld [vmem:[%s1266_s1 + $0xac] ss:$16 sps:$4 sm:$0xff]   ;;  %v948_v23 = vld [vmem:[%s1266_s1 + $0xa0] ss:$16 sps:$4 sm:$0xff]   ;;  %v949_v24 = vld [vmem:[%s1266_s1 + $0xa8] ss:$16 sps:$4 sm:$0xff]  }
   0x9   :  { %v950_v25 = vld [vmem:[%s1266_s1 + $0xc4] ss:$16 sps:$4 sm:$0xff]   ;;  %v952_v26 = vld [vmem:[%s1266_s1 + $0xcc] ss:$16 sps:$4 sm:$0xff]   ;;  %v954_v27 = vld [vmem:[%s1266_s1 + $0xc0] ss:$16 sps:$4 sm:$0xff]  }
   0xa   :  { %v955_v28 = vld [vmem:[%s1266_s1 + $0xc8] ss:$16 sps:$4 sm:$0xff]   ;;  %v956_v29 = vld [vmem:[%s1266_s1 + $0xe4] ss:$16 sps:$4 sm:$0xff]   ;;  %v958_v30 = vld [vmem:[%s1266_s1 + $0xec] ss:$16 sps:$4 sm:$0xff]  }
   0xb   :  { %261 = vmatpush1.bf16.msra.mxu0 %v930_v11  ;;  %304 = vmatpush1.bf16.msra.mxu1 %v931_v12  ;;  %v960_v31 = vld [vmem:[%s1266_s1 + $0xe0] ss:$16 sps:$4 sm:$0xff]   ;;  %v961_v32 = vld [vmem:[%s1266_s1 + $0xe8] ss:$16 sps:$4 sm:$0xff]   ;;  %v71_v3 = vshrl.u32 %v70_v2, 7 }
   0xc   :  { %262 = vmatprep.subr.bf16.mxu0 %v932_v13  ;;  %305 = vmatprep.subr.bf16.mxu1 %v934_v14  ;;  %v962_v33 = vld [vmem:[%s1267_s0] sm:$0xff]   ;;  %v967_v38 = vld [vmem:[%s1268_s3 + $0x48] sm:$0xff]   ;;  %v971_v42 = vld [vmem:[%s1268_s3 + $0x50] sm:$0xff]  }
   0xd   :  { %v963_v34 = vld [vmem:[%s1268_s3 + $0x40] sm:$0xff]   ;;  %v968_v39 = vld [vmem:[%s1268_s3 + $0xc8] sm:$0xff]   ;;  %v972_v43 = vld [vmem:[%s1268_s3 + $0xd0] sm:$0xff]   ;;  %v80_v4 = vsub.s32 2, %v71_v3  ;;  %v84_v5 = vsub.s32 3, %v71_v3  ;;  %v72_v6 = vsub.s32 0, %v71_v3 }
   0xe   :  { %v964_v35 = vld [vmem:[%s1268_s3 + $0xc0] sm:$0xff]   ;;  %v969_v40 = vld [vmem:[%s1268_s3 + $0x8] sm:$0xff]   ;;  %v973_v44 = vld [vmem:[%s1268_s3 + $0x10] sm:$0xff]   ;;  %v76_v8 = vsub.s32 1, %v71_v3 }
   0xf   :  { %263 = vmatpush1.bf16.msra.mxu0 %v936_v15  ;;  %306 = vmatpush1.bf16.msra.mxu1 %v937_v16  ;;  %v965_v36 = vld [vmem:[%s1268_s3] sm:$0xff]   ;;  %v970_v41 = vld [vmem:[%s1268_s3 + $0x88] sm:$0xff]   ;;  %v974_v45 = vld [vmem:[%s1268_s3 + $0x90] sm:$0xff]  }
  0x10   :  { %264 = vmatprep.subr.bf16.mxu0 %v938_v17  ;;  %307 = vmatprep.subr.bf16.mxu1 %v940_v18  ;;  %v966_v37 = vld [vmem:[%s1268_s3 + $0x80] sm:$0xff]   ;;  %v975_v46 = vld [vmem:[%s1268_s3 + $0x58] sm:$0xff]   ;;  %v983_v54 = vld [vmem:[%s1268_s3 + $0x68] sm:$0xff]  }
  0x11   :  { %v976_v47 = vld [vmem:[%s1268_s3 + $0xd8] sm:$0xff]   ;;  %v979_v50 = vld [vmem:[%s1268_s3 + $0x60] sm:$0xff]   ;;  %v984_v55 = vld [vmem:[%s1268_s3 + $0xe8] sm:$0xff]  }
  0x12   :  { %v977_v48 = vld [vmem:[%s1268_s3 + $0x18] sm:$0xff]   ;;  %v980_v51 = vld [vmem:[%s1268_s3 + $0xe0] sm:$0xff]   ;;  %v985_v56 = vld [vmem:[%s1268_s3 + $0x28] sm:$0xff]  }
  0x13   :  { %265 = vmatpush1.bf16.msra.mxu0 %v942_v19  ;;  %308 = vmatpush1.bf16.msra.mxu1 %v943_v20  ;;  %v978_v49 = vld [vmem:[%s1268_s3 + $0x98] sm:$0xff]   ;;  %v981_v52 = vld [vmem:[%s1268_s3 + $0x20] sm:$0xff]   ;;  %v986_v57 = vld [vmem:[%s1268_s3 + $0xa8] sm:$0xff]  }
  0x14   :  { %266 = vmatprep.subr.bf16.mxu0 %v944_v21  ;;  %309 = vmatprep.subr.bf16.mxu1 %v946_v22  ;;  %v982_v53 = vld [vmem:[%s1268_s3 + $0xa0] sm:$0xff]   ;;  %v987_v58 = vld [vmem:[%s1268_s3 + $0x70] sm:$0xff]   ;;  %v991_v62 = vld [vmem:[%s1268_s3 + $0x78] sm:$0xff]  }
  0x15   :  { %v988_v59 = vld [vmem:[%s1268_s3 + $0xf0] sm:$0xff]   ;;  %v992_v63 = vld [vmem:[%s1268_s3 + $0xf8] sm:$0xff]   ;;  %v68_v7 = vld [vmem:[%s1269_s2] sm:$0xf] }
  0x16   :  { %v989_v60 = vld [vmem:[%s1268_s3 + $0x30] sm:$0xff]   ;;  %v993_v0 = vld [vmem:[%s1268_s3 + $0x38] sm:$0xff]   ;;  %v81_v9 = vrot.slane %v68_v7, %v80_v4  ;;  %v85_v10 = vrot.slane %v68_v7, %v84_v5  ;;  %v73_v11 = vrot.slane %v68_v7, %v72_v6  ;;  %v77_v14 = vrot.slane %v68_v7, %v76_v8  ;;  %v821_v7 = vld [vmem:[%s1270_s4] ss:$0 sm:$0xff] }
  0x17   :  { %267 = vmatpush1.bf16.msra.mxu0 %v948_v23  ;;  %310 = vmatpush1.bf16.msra.mxu1 %v949_v24  ;;  %v990_v61 = vld [vmem:[%s1268_s3 + $0xb0] sm:$0xff]   ;;  %v994_v1 = vld [vmem:[%s1268_s3 + $0xb8] sm:$0xff]  }
  0x18   :  { %268 = vmatprep.subr.bf16.mxu0 %v950_v25  ;;  %311 = vmatprep.subr.bf16.mxu1 %v952_v26 }
  0x1b   :  { %269 = vmatpush1.bf16.msra.mxu0 %v954_v27  ;;  %312 = vmatpush1.bf16.msra.mxu1 %v955_v28 }
  0x1c   :  { %270 = vmatprep.subr.bf16.mxu0 %v956_v29  ;;  %313 = vmatprep.subr.bf16.mxu1 %v958_v30 }
  0x1f   :  { %271 = vmatpush1.bf16.msra.mxu0 %v960_v31  ;;  %314 = vmatpush1.bf16.msra.mxu1 %v961_v32 }
  0x20   :  { %869 = vmatprep.subr.bf16.mxu0 %v963_v34  ;;  %891 = vmatprep.subr.bf16.mxu1 %v964_v35 }
  0x22   :  { %289 = vmatmul.mubr.bf16.vlgmr.msra.gmra.mrb[0].mxu0 %v962_v33  ;;  %332 = vmatmul.mubr.bf16.vlgmr.msra.gmra.mrb[0].mxu1 %v962_v33 }
  0x23   :  { %870 = vmatpush3.bf16.msra.mxu0 %v965_v36  ;;  %892 = vmatpush3.bf16.msra.mxu1 %v966_v37 }
  0x24   :  { %871 = vmatprep.subr.bf16.mxu0 %v967_v38  ;;  %893 = vmatprep.subr.bf16.mxu1 %v968_v39 }
  0x27   :  { %872 = vmatpush3.bf16.msra.mxu0 %v969_v40  ;;  %894 = vmatpush3.bf16.msra.mxu1 %v970_v41 }
  0x28   :  { %873 = vmatprep.subr.bf16.mxu0 %v971_v42  ;;  %895 = vmatprep.subr.bf16.mxu1 %v972_v43 }
  0x2b   :  { %874 = vmatpush3.bf16.msra.mxu0 %v973_v44  ;;  %896 = vmatpush3.bf16.msra.mxu1 %v974_v45 }
  0x2c   :  { %875 = vmatprep.subr.bf16.mxu0 %v975_v46  ;;  %897 = vmatprep.subr.bf16.mxu1 %v976_v47 }
  0x2f   :  { %876 = vmatpush3.bf16.msra.mxu0 %v977_v48  ;;  %898 = vmatpush3.bf16.msra.mxu1 %v978_v49 }
  0x30   :  { %877 = vmatprep.subr.bf16.mxu0 %v979_v50  ;;  %899 = vmatprep.subr.bf16.mxu1 %v980_v51 }
  0x33   :  { %878 = vmatpush3.bf16.msra.mxu0 %v981_v52  ;;  %900 = vmatpush3.bf16.msra.mxu1 %v982_v53 }
  0x34   :  { %879 = vmatprep.subr.bf16.mxu0 %v983_v54  ;;  %901 = vmatprep.subr.bf16.mxu1 %v984_v55 }
  0x37   :  { %880 = vmatpush3.bf16.msra.mxu0 %v985_v56  ;;  %902 = vmatpush3.bf16.msra.mxu1 %v986_v57 }
  0x38   :  { %881 = vmatprep.subr.bf16.mxu0 %v987_v58  ;;  %903 = vmatprep.subr.bf16.mxu1 %v988_v59 }
  0x3b   :  { %882 = vmatpush3.bf16.msra.mxu0 %v989_v60  ;;  %904 = vmatpush3.bf16.msra.mxu1 %v990_v61 }
  0x3c   :  { %883 = vmatprep.subr.bf16.mxu0 %v991_v62  ;;  %905 = vmatprep.subr.bf16.mxu1 %v992_v63 }
  0x3f   :  { %884 = vmatpush3.bf16.msra.mxu0 %v993_v0  ;;  %906 = vmatpush3.bf16.msra.mxu1 %v994_v1 }
  0xf5   :  { %v290_v12 = vpop.f32.mrb[0].mxu0  ;;  %v333_v13 = vpop.f32.mrb[0].mxu1 }
  0xf6   :  { %v334_v15 = vadd.f32 %v333_v13, %v81_v9  ;;  %v292_v16 = vpop.f32.mrb[1].mxu0  ;;  %v335_v17 = vpop.f32.mrb[1].mxu1  ;;  %v291_v21 = vadd.f32 %v290_v12, %v73_v11 }
  0xf7   :  { %v336_v18 = vadd.f32 %v335_v17, %v85_v10  ;;  %v294_v19 = vpop.f32.mrb[2].mxu0  ;;  %v337_v20 = vpop.f32.mrb[2].mxu1  ;;  %v293_v26 = vadd.f32 %v292_v16, %v77_v14 }
  0xf8   :  { %v295_v22 = vadd.f32 %v294_v19, %v73_v11  ;;  %v338_v23 = vadd.f32 %v337_v20, %v81_v9  ;;  %v296_v24 = vpop.f32.mrb[3].mxu0  ;;  %v339_v25 = vpop.f32.mrb[3].mxu1  ;;  %v861_v9 = vld [vmem:[%s1271_s5] sm:$0xff]  }
  0xf9   :  { %v297_v27 = vadd.f32 %v296_v24, %v77_v14  ;;  %v340_v28 = vadd.f32 %v339_v25, %v85_v10  ;;  %v862_v19 = vunpack.c.l.bf16 %v861_v9  ;;  %v863_v25 = vunpack.c.h.bf16 %v861_v9 }
  0xfa   :  { %v342_v29 = vpack.c.bf16 %v295_v22, %v291_v21  ;;  %v344_v30 = vpack.c.bf16 %v338_v23, %v334_v15 }
  0xfb   :  { %v343_v31 = vpack.c.bf16 %v297_v27, %v293_v26  ;;  %v345_v32 = vpack.c.bf16 %v340_v28, %v336_v18 }
  0xfc   :  { %v346_v33 = vmul.bf16 %v342_v29, %v342_v29  ;;  %v348_v34 = vmul.bf16 %v344_v30, %v344_v30 }
  0xfd   :  { %v347_v35 = vmul.bf16 %v343_v31, %v343_v31  ;;  %v349_v36 = vmul.bf16 %v345_v32, %v345_v32 }
  0xfe   :  { %v350_v37 = vmul.bf16 %v346_v33, %v342_v29  ;;  %v352_v38 = vmul.bf16 %v348_v34, %v344_v30 }
  0xff   :  { %v351_v39 = vmul.bf16 %v347_v35, %v343_v31  ;;  %v353_v40 = vmul.bf16 %v349_v36, %v345_v32 }
 0x100   :  { %v354_v41 = vmul.bf16 1027030327, %v350_v37  ;;  %v356_v42 = vmul.bf16 1027030327, %v352_v38 }
 0x101   :  { %v355_v43 = vmul.bf16 1027030327, %v351_v39  ;;  %v357_v44 = vmul.bf16 1027030327, %v353_v40 }
 0x102   :  { %v358_v45 = vadd.bf16 %v354_v41, %v342_v29  ;;  %v360_v46 = vadd.bf16 %v356_v42, %v344_v30 }
 0x103   :  { %v359_v47 = vadd.bf16 %v355_v43, %v343_v31  ;;  %v361_v48 = vadd.bf16 %v357_v44, %v345_v32  ;;  %v854_v43 = vld [vmem:[%s1272_s6] ss:$0 sm:$0xff] }
 0x104   :  { %v362_v49 = vmul.bf16 1061961548, %v358_v45  ;;  %v364_v50 = vmul.bf16 1061961548, %v360_v46 }
 0x105   :  { %v363_v51 = vmul.bf16 1061961548, %v359_v47  ;;  %v365_v52 = vmul.bf16 1061961548, %v361_v48  ;;  %v855_v47 = vld [vmem:[%s1273_s7] ss:$0 sm:$0xff] }
 0x106   :  { %995 = vtanh.bf16 %v362_v49 }
 0x107   :  { %997 = vtanh.bf16 %v364_v50 }
 0x108   :  { %999 = vtanh.bf16 %v363_v51 }
 0x109   :  { %1001 = vtanh.bf16 %v365_v52 }
 0x111   :  { %v996_v53 = vpop.eup %995 }
 0x112   :  { %v998_v54 = vpop.eup %997  ;;  %v370_v55 = vadd.bf16 1065369472, %v996_v53 }
 0x113   :  { %v1000_v56 = vpop.eup %999  ;;  %v372_v57 = vadd.bf16 1065369472, %v998_v54 }
 0x114   :  { %v1002_v58 = vpop.eup %1001  ;;  %v371_v59 = vadd.bf16 1065369472, %v1000_v56  ;;  %v374_v61 = vmul.bf16 1056980736, %v370_v55 }
 0x115   :  { %v373_v60 = vadd.bf16 1065369472, %v1002_v58  ;;  %v376_v63 = vmul.bf16 1056980736, %v372_v57 }
 0x116   :  { %v375_v62 = vmul.bf16 1056980736, %v371_v59  ;;  %v378_v3 = vmul.bf16 %v374_v61, %v342_v29 }
 0x117   :  { %v377_v0 = vmul.bf16 1056980736, %v373_v60  ;;  %v380_v4 = vmul.bf16 %v376_v63, %v344_v30 }
 0x118   :  { %v379_v1 = vmul.bf16 %v375_v62, %v343_v31 }
 0x119   :  { %v381_v2 = vmul.bf16 %v377_v0, %v345_v32 }
 0x11a   :  { %677 = vmatprep.mubr.bf16.mxu0 %v379_v1 }
 0x11b   :  { %718 = vmatprep.mubr.bf16.mxu1 %v381_v2  ;;  %678 = vmatmul.mubr.bf16.vlgmr.msra.gmra.mrb[4].mxu0 %v378_v3 }
 0x11c   :  { %719 = vmatmul.mubr.bf16.vlgmr.msra.gmra.mrb[4].mxu1 %v380_v4 }
 0x1ee   :  { %v885_v5 = vpop.f32.mrb[4].mxu0 }
 0x1ef   :  { %v907_v6 = vpop.f32.mrb[4].mxu1  ;;  %v886_v8 = vpop.f32.mrb[5].mxu0 }
 0x1f0   :  { %v887_v10 = vadd.f32 %v886_v8, %v885_v5  ;;  %v908_v11 = vpop.f32.mrb[5].mxu1  ;;  %v888_v12 = vpop.f32.mrb[6].mxu0 }
 0x1f1   :  { %v909_v13 = vadd.f32 %v908_v11, %v907_v6  ;;  %v910_v14 = vpop.f32.mrb[6].mxu1  ;;  %v889_v15 = vpop.f32.mrb[7].mxu0 }
 0x1f2   :  { %v680_v16 = vadd.f32 %v887_v10, %v821_v7  ;;  %v890_v17 = vadd.f32 %v889_v15, %v888_v12  ;;  %v911_v18 = vpop.f32.mrb[7].mxu1 }
 0x1f3   :  { %v912_v20 = vadd.f32 %v911_v18, %v910_v14 }
 0x1f4   :  { %v721_v21 = vadd.f32 %v909_v13, %v680_v16  ;;  %v683_v22 = vadd.f32 %v890_v17, %v821_v7 }
 0x1f6   :  { %v724_v23 = vadd.f32 %v912_v20, %v683_v22  ;;  %v731_v24 = vadd.f32 %v862_v19, %v721_v21 }
 0x1f8   :  { %735 = vadd.xlane.f32.xlu0 %v731_v24  ;;  %v732_v26 = vadd.f32 %v863_v25, %v724_v23 }
 0x1fc   :  { %737 = vadd.xlane.f32.xlu0 %v732_v26 }
 0x285   :  { %v736_v27 = vpop.xlane.xlu0 %735 }
 0x286   :  { %v740_v28 = vmul.f32 0.0078125, %v736_v27 }
 0x288   :  { %v742_v29 = vsub.f32 %v731_v24, %v740_v28 }
 0x289   :  { %v738_v30 = vpop.xlane.xlu0 %737 }
 0x28a   :  { %v741_v31 = vmul.f32 0.0078125, %v738_v30  ;;  %v744_v32 = vmul.f32 %v742_v29, %v742_v29 }
 0x28c   :  { %v743_v33 = vsub.f32 %v732_v26, %v741_v31  ;;  %746 = vadd.xlane.f32.xlu1 %v744_v32 }
 0x28e   :  { %v745_v34 = vmul.f32 %v743_v33, %v743_v33 }
 0x290   :  { %748 = vadd.xlane.f32.xlu1 %v745_v34 }
 0x319   :  { %v747_v35 = vpop.xlane.xlu1 %746 }
 0x31a   :  { %v750_v36 = vmul.f32 0.0078125, %v747_v35 }
 0x31c   :  { %v752_v37 = vadd.f32 1e-05, %v750_v36 }
 0x31d   :  { %v749_v38 = vpop.xlane.xlu1 %748 }
 0x31e   :  { %1003 = vrsqrt.f32 %v752_v37  ;;  %v751_v39 = vmul.f32 0.0078125, %v749_v38 }
 0x320   :  { %v753_v40 = vadd.f32 1e-05, %v751_v39 }
 0x322   :  { %1005 = vrsqrt.f32 %v753_v40 }
 0x328   :  { %v1004_v41 = vpop.eup %1003 }
 0x329   :  { %v756_v42 = vmul.f32 %v1004_v41, %v742_v29 }
 0x32b   :  { %v764_v45 = vmul.f32 %v854_v43, %v756_v42 }
 0x32c   :  { %v1006_v44 = vpop.eup %1005 }
 0x32d   :  { %v757_v46 = vmul.f32 %v1006_v44, %v743_v33  ;;  %v772_v49 = vadd.f32 %v855_v47, %v764_v45 }
 0x32f   :  { %v765_v48 = vmul.f32 %v854_v43, %v757_v46 }
 0x331   :  { %v773_v50 = vadd.f32 %v855_v47, %v765_v48 }
 0x333   :  { %v867_v51 = vpack.c.bf16 %v773_v50, %v772_v49 }
 0x335   :  { %868 = vst [vmem:[%s1274_s8] sm:$0xff] %v867_v51  }

</bundles_post_ra>
